<compile_context>
chip_gen: v7x
topology: tpu7x:2x2x1
jax: 0.10.0
libtpu: 0.0.40
codegen_flags: <defaults>
</compile_context>

<pallas_src>
import functools
import math

import numpy as np
import jax
import jax.numpy as jnp
from jax.experimental import pallas as pl
from jax.experimental.pallas import tpu as pltpu


# ----------------------------------------------------------------------------
# Relative position embedding table (host-side, numpy; identical to the torch
# helper -- computing for length=S equals computing for 512 and slicing [:S,:S]).
# ----------------------------------------------------------------------------
def generate_relative_positions_embeddings(length, depth, max_relative_position=127):
    vocab_size = max_relative_position * 2 + 1
    range_vec = np.arange(length)
    distance_mat = range_vec[None, :] - range_vec[:, None]            # d[i, j] = j - i
    distance_clipped = np.clip(distance_mat, -max_relative_position, max_relative_position)
    final_mat = distance_clipped + max_relative_position
    table = np.zeros([vocab_size, depth], dtype=np.float32)
    for pos in range(vocab_size):
        for i in range(depth // 2):
            table[pos, 2 * i] = np.sin(pos / np.power(10000, 2 * i / depth))
            table[pos, 2 * i + 1] = np.cos(pos / np.power(10000, 2 * i / depth))
    return jnp.asarray(table[final_mat])                              # [L, L, depth]


# ----------------------------------------------------------------------------
# Fused BertAttention kernel: one batch element per grid step.
# ----------------------------------------------------------------------------
def _bert_attention_kernel(x_ref, mask_ref, rel_ref,
                           wq_ref, wk_ref, wv_ref, wo_ref,
                           bq_ref, bk_ref, bv_ref, bo_ref,
                           gamma_ref, beta_ref,
                           out_ref, att_ref,
                           *, num_heads, head_dim, scale, eps):
    x = x_ref[0]                                   # [S, H]
    rel = rel_ref[...]                             # [S, S, dh]
    mask = mask_ref[0]                             # [1, S] additive mask

    # Fused Q/K/V projections -- full hidden-width MXU matmuls.
    q = jnp.dot(x, wq_ref[...], preferred_element_type=jnp.float32) + bq_ref[...]
    k = jnp.dot(x, wk_ref[...], preferred_element_type=jnp.float32) + bk_ref[...]
    v = jnp.dot(x, wv_ref[...], preferred_element_type=jnp.float32) + bv_ref[...]

    ctx_heads = []
    for h in range(num_heads):                     # static unroll over heads
        sl = slice(h * head_dim, (h + 1) * head_dim)
        qh, kh, vh = q[:, sl], k[:, sl], v[:, sl]  # [S, dh]

        # q @ k^T on the MXU (contract last dims; no explicit transpose).
        scores = jax.lax.dot_general(qh, kh, (((1,), (1,)), ((), ())),
                                     preferred_element_type=jnp.float32)   # [S, S]
        # relative-position key scores: einsum('qd,qkd->qk') via broadcast + lane reduce.
        key_pos = jnp.sum(qh[:, None, :] * rel, axis=-1)                    # [S, S]
        scores = (scores + key_pos) * scale + mask
        att_ref[0, h] = scores.astype(att_ref.dtype)

        # numerically stable softmax over keys
        m = jnp.max(scores, axis=-1, keepdims=True)
        e = jnp.exp(scores - m)
        probs = e * pl.reciprocal(jnp.sum(e, axis=-1, keepdims=True))
        # TODO(synk): attention-probs dropout is an eval-mode identity here.

        ctx = jnp.dot(probs.astype(vh.dtype), vh, preferred_element_type=jnp.float32)
        # relative-position value scores: einsum('qk,qkd->qd') via broadcast + sublane reduce.
        ctx = ctx + jnp.sum(probs[:, :, None] * rel, axis=1)                # [S, dh]
        ctx_heads.append(ctx)

    ctx = jnp.concatenate(ctx_heads, axis=-1)       # [S, H]  (head merge, in-register)

    # BertSelfOutput: Dense + (dropout=identity) + residual + TF-style LayerNorm.
    y = jnp.dot(ctx, wo_ref[...], preferred_element_type=jnp.float32) + bo_ref[...]
    # TODO(synk): hidden-state dropout is an eval-mode identity here.
    y = y + x.astype(jnp.float32)

    u = jnp.mean(y, axis=-1, keepdims=True)
    d = y - u
    var = jnp.mean(d * d, axis=-1, keepdims=True)
    inv = jax.lax.rsqrt(var + eps)                  # one rsqrt per row (EUP)
    out_ref[0] = (d * (gamma_ref[...] * inv) + beta_ref[...]).astype(out_ref.dtype)


# ----------------------------------------------------------------------------
# Full BertAttention forward.
# ----------------------------------------------------------------------------
def nezha_bert_attention(hidden_states, attention_mask, params, rel_emb, *,
                         num_heads, eps=1e-12):
    """hidden_states: [B,S,H]; attention_mask: additive, reshapeable to [B,1,1,S];
    weights are stored pre-transposed as [in, out] so kernels do x @ W directly."""
    B, S, Hd = hidden_states.shape
    dh = Hd // num_heads
    x = hidden_states
    mask3 = jnp.asarray(attention_mask, jnp.float32).reshape(B, 1, S)

    batch_spec = pl.BlockSpec((1, S, Hd), lambda b: (b, 0, 0))
    mask_spec = pl.BlockSpec((1, 1, S), lambda b: (b, 0, 0))
    # grid-invariant operands -> constant index_maps, fetched once
    rel_spec = pl.BlockSpec((S, S, dh), lambda b: (0, 0, 0))
    w_spec = pl.BlockSpec((Hd, Hd), lambda b: (0, 0))
    vec_spec = pl.BlockSpec((1, Hd), lambda b: (0, 0))
    att_spec = pl.BlockSpec((1, num_heads, S, S), lambda b: (b, 0, 0, 0))

    kernel = functools.partial(_bert_attention_kernel,
                               num_heads=num_heads, head_dim=dh,
                               scale=1.0 / math.sqrt(dh), eps=eps)

    out, layer_att = pl.pallas_call(
        kernel,
        out_shape=(jax.ShapeDtypeStruct((B, S, Hd), x.dtype),
                   jax.ShapeDtypeStruct((B, num_heads, S, S), jnp.float32)),
        grid_spec=pltpu.PrefetchScalarGridSpec(
            num_scalar_prefetch=0,
            grid=(B,),
            in_specs=[batch_spec, mask_spec, rel_spec,
                      w_spec, w_spec, w_spec, w_spec,
                      vec_spec, vec_spec, vec_spec, vec_spec,
                      vec_spec, vec_spec],
            out_specs=(batch_spec, att_spec),
        ),
        compiler_params=pltpu.CompilerParams(
            dimension_semantics=("parallel",),
            vmem_limit_bytes=100 * 1024 * 1024),
    )(x, mask3, rel_emb.astype(jnp.float32),
      params["wq"], params["wk"], params["wv"], params["wo"],
      params["bq"].reshape(1, Hd), params["bk"].reshape(1, Hd),
      params["bv"].reshape(1, Hd), params["bo"].reshape(1, Hd),
      params["gamma"].reshape(1, Hd), params["beta"].reshape(1, Hd))
    # TODO(synk): for very long sequences the [S,S,dh] relative-position table no longer
    # fits VMEM; that regime would need an additional query-block grid axis.
    return out, layer_att


# ----------------------------------------------------------------------------
# Pure-JAX reference (mirrors the PyTorch module exactly).
# ----------------------------------------------------------------------------
def reference(hidden_states, attention_mask, params, rel_emb, *, num_heads, eps=1e-12):
    PH = jax.lax.Precision.HIGHEST
    B, S, Hd = hidden_states.shape
    dh = Hd // num_heads

    def dense(x, w, b):
        return jnp.einsum("bsh,hk->bsk", x, w, precision=PH) + b

    def to_heads(t):
        return t.reshape(B, S, num_heads, dh).transpose(0, 2, 1, 3)

    q = to_heads(dense(hidden_states, params["wq"], params["bq"]))
    k = to_heads(dense(hidden_states, params["wk"], params["bk"]))
    v = to_heads(dense(hidden_states, params["wv"], params["bv"]))

    scores = jnp.einsum("bhqd,bhkd->bhqk", q, k, precision=PH)
    scores = scores + jnp.einsum("bhqd,qkd->bhqk", q, rel_emb, precision=PH)
    scores = scores / math.sqrt(dh)
    scores = scores + attention_mask.reshape(B, 1, 1, S)
    probs = jax.nn.softmax(scores, axis=-1)

    ctx = jnp.einsum("bhqk,bhkd->bhqd", probs, v, precision=PH)
    ctx = ctx + jnp.einsum("bhqk,qkd->bhqd", probs, rel_emb, precision=PH)
    ctx = ctx.transpose(0, 2, 1, 3).reshape(B, S, Hd)

    x = dense(ctx, params["wo"], params["bo"]) + hidden_states
    u = jnp.mean(x, -1, keepdims=True)
    s = jnp.mean((x - u) ** 2, -1, keepdims=True)
    xn = (x - u) / jnp.sqrt(s + eps)
    return params["gamma"] * xn + params["beta"], scores


if __name__ == "__main__":
    # Small config: batch=2, seq=8, hidden=32, heads=4 (head_size=8), max_rel=16.
    B, S, Hd, nH = 2, 8, 32, 4
    max_rel = 16
    eps = 1e-12

    key = jax.random.PRNGKey(0)
    ks = jax.random.split(key, 9)
    hidden_states = jax.random.normal(ks[0], (B, S, Hd), dtype=jnp.float32)

    # additive attention mask: batch 0 fully valid, batch 1 has 2 padded positions.
    valid = jnp.array([[1.0] * S, [1.0] * (S - 2) + [0.0] * 2], dtype=jnp.float32)
    attention_mask = (1.0 - valid)[:, None, None, :] * -10000.0          # [B,1,1,S]

    def lin(k, shape):
        return jax.random.normal(k, shape, dtype=jnp.float32) * 0.05

    params = dict(
        wq=lin(ks[1], (Hd, Hd)), bq=lin(ks[2], (Hd,)),
        wk=lin(ks[3], (Hd, Hd)), bk=lin(ks[4], (Hd,)),
        wv=lin(ks[5], (Hd, Hd)), bv=lin(ks[6], (Hd,)),
        wo=lin(ks[7], (Hd, Hd)), bo=lin(ks[8], (Hd,)),
        gamma=jnp.ones((Hd,), jnp.float32),
        beta=jnp.zeros((Hd,), jnp.float32),
    )

    rel_emb = generate_relative_positions_embeddings(S, Hd // nH, max_rel)  # [S,S,dh]

    out, layer_att = nezha_bert_attention(hidden_states, attention_mask, params, rel_emb,
                                          num_heads=nH, eps=eps)
    out = jax.block_until_ready(out)
    layer_att = jax.block_until_ready(layer_att)

    ref_out, ref_att = reference(hidden_states, attention_mask, params, rel_emb,
                                 num_heads=nH, eps=eps)

    assert out.shape == (B, S, Hd)
    assert layer_att.shape == (B, nH, S, S)
    assert jnp.allclose(out, ref_out, atol=1e-4, rtol=1e-4), "attention_output mismatch"
    assert jnp.allclose(layer_att, ref_att, atol=1e-4, rtol=1e-4), "layer_att mismatch"

    print("KERNEL_OK")
</pallas_src>

<mosaic_0001>
module attributes {stable_mosaic.version = 11 : i64} {
  func.func @_bert_attention_kernel(%arg0: i32, %arg1: memref<1x8x32xf32, #tpu.memory_space<vmem>>, %arg2: memref<1x1x8xf32, #tpu.memory_space<vmem>>, %arg3: memref<8x8x8xf32, #tpu.memory_space<vmem>>, %arg4: memref<32x32xf32, #tpu.memory_space<vmem>>, %arg5: memref<32x32xf32, #tpu.memory_space<vmem>>, %arg6: memref<32x32xf32, #tpu.memory_space<vmem>>, %arg7: memref<32x32xf32, #tpu.memory_space<vmem>>, %arg8: memref<1x32xf32, #tpu.memory_space<vmem>>, %arg9: memref<1x32xf32, #tpu.memory_space<vmem>>, %arg10: memref<1x32xf32, #tpu.memory_space<vmem>>, %arg11: memref<1x32xf32, #tpu.memory_space<vmem>>, %arg12: memref<1x32xf32, #tpu.memory_space<vmem>>, %arg13: memref<1x32xf32, #tpu.memory_space<vmem>>, %arg14: memref<1x8x32xf32, #tpu.memory_space<vmem>>, %arg15: memref<1x4x8x8xf32, #tpu.memory_space<vmem>>) attributes {dimension_semantics = [#tpu.dimension_semantics<parallel>], iteration_bounds = array<i64: 2>, scalar_prefetch = 0 : i64, scratch_operands = 0 : i64, tpu.core_type = #tpu.core_type<tc>, window_params = [{transform_indices = @transform_0, window_bounds = array<i64: 1, 8, 32>}, {transform_indices = @transform_1, window_bounds = array<i64: 1, 1, 8>}, {pipeline_mode = #tpu.pipeline_mode<synchronous>, transform_indices = @transform_2, window_bounds = array<i64: 8, 8, 8>}, {pipeline_mode = #tpu.pipeline_mode<synchronous>, transform_indices = @transform_3, window_bounds = array<i64: 32, 32>}, {pipeline_mode = #tpu.pipeline_mode<synchronous>, transform_indices = @transform_4, window_bounds = array<i64: 32, 32>}, {pipeline_mode = #tpu.pipeline_mode<synchronous>, transform_indices = @transform_5, window_bounds = array<i64: 32, 32>}, {pipeline_mode = #tpu.pipeline_mode<synchronous>, transform_indices = @transform_6, window_bounds = array<i64: 32, 32>}, {pipeline_mode = #tpu.pipeline_mode<synchronous>, transform_indices = @transform_7, window_bounds = array<i64: 1, 32>}, {pipeline_mode = #tpu.pipeline_mode<synchronous>, transform_indices = @transform_8, window_bounds = array<i64: 1, 32>}, {pipeline_mode = #tpu.pipeline_mode<synchronous>, transform_indices = @transform_9, window_bounds = array<i64: 1, 32>}, {pipeline_mode = #tpu.pipeline_mode<synchronous>, transform_indices = @transform_10, window_bounds = array<i64: 1, 32>}, {pipeline_mode = #tpu.pipeline_mode<synchronous>, transform_indices = @transform_11, window_bounds = array<i64: 1, 32>}, {pipeline_mode = #tpu.pipeline_mode<synchronous>, transform_indices = @transform_12, window_bounds = array<i64: 1, 32>}, {transform_indices = @transform_13, window_bounds = array<i64: 1, 8, 32>}, {transform_indices = @transform_14, window_bounds = array<i64: 1, 4, 8, 8>}]} {
    %c0 = arith.constant 0 : index
    %c0_0 = arith.constant 0 : index
    %c0_1 = arith.constant 0 : index
    %0 = vector.load %arg1[%c0, %c0_0, %c0_1] : memref<1x8x32xf32, #tpu.memory_space<vmem>>, vector<1x8x32xf32>
    %1 = vector.shape_cast %0 : vector<1x8x32xf32> to vector<8x32xf32>
    %c0_2 = arith.constant 0 : index
    %c0_3 = arith.constant 0 : index
    %c0_4 = arith.constant 0 : index
    %2 = vector.load %arg3[%c0_2, %c0_3, %c0_4] : memref<8x8x8xf32, #tpu.memory_space<vmem>>, vector<8x8x8xf32>
    %c0_5 = arith.constant 0 : index
    %c0_6 = arith.constant 0 : index
    %c0_7 = arith.constant 0 : index
    %3 = vector.load %arg2[%c0_5, %c0_6, %c0_7] : memref<1x1x8xf32, #tpu.memory_space<vmem>>, vector<1x1x8xf32>
    %4 = vector.shape_cast %3 : vector<1x1x8xf32> to vector<1x8xf32>
    %c0_8 = arith.constant 0 : index
    %c0_9 = arith.constant 0 : index
    %5 = vector.load %arg4[%c0_8, %c0_9] : memref<32x32xf32, #tpu.memory_space<vmem>>, vector<32x32xf32>
    %cst = arith.constant dense<0.000000e+00> : vector<8x32xf32>
    %6 = tpu.matmul %1, %5, %cst {dimension_numbers = #tpu.dot_dimension_numbers<[1], [0], [0], [1], [0, 0, 1, 1], [], []>} : vector<8x32xf32>, vector<32x32xf32>, vector<8x32xf32> -> vector<8x32xf32>
    %c0_10 = arith.constant 0 : index
    %c0_11 = arith.constant 0 : index
    %7 = vector.load %arg8[%c0_10, %c0_11] : memref<1x32xf32, #tpu.memory_space<vmem>>, vector<1x32xf32>
    %8 = vector.broadcast %7 : vector<1x32xf32> to vector<8x32xf32>
    %9 = arith.addf %6, %8 : vector<8x32xf32>
    %c0_12 = arith.constant 0 : index
    %c0_13 = arith.constant 0 : index
    %10 = vector.load %arg5[%c0_12, %c0_13] : memref<32x32xf32, #tpu.memory_space<vmem>>, vector<32x32xf32>
    %cst_14 = arith.constant dense<0.000000e+00> : vector<8x32xf32>
    %11 = tpu.matmul %1, %10, %cst_14 {dimension_numbers = #tpu.dot_dimension_numbers<[1], [0], [0], [1], [0, 0, 1, 1], [], []>} : vector<8x32xf32>, vector<32x32xf32>, vector<8x32xf32> -> vector<8x32xf32>
    %c0_15 = arith.constant 0 : index
    %c0_16 = arith.constant 0 : index
    %12 = vector.load %arg9[%c0_15, %c0_16] : memref<1x32xf32, #tpu.memory_space<vmem>>, vector<1x32xf32>
    %13 = vector.broadcast %12 : vector<1x32xf32> to vector<8x32xf32>
    %14 = arith.addf %11, %13 : vector<8x32xf32>
    %c0_17 = arith.constant 0 : index
    %c0_18 = arith.constant 0 : index
    %15 = vector.load %arg6[%c0_17, %c0_18] : memref<32x32xf32, #tpu.memory_space<vmem>>, vector<32x32xf32>
    %cst_19 = arith.constant dense<0.000000e+00> : vector<8x32xf32>
    %16 = tpu.matmul %1, %15, %cst_19 {dimension_numbers = #tpu.dot_dimension_numbers<[1], [0], [0], [1], [0, 0, 1, 1], [], []>} : vector<8x32xf32>, vector<32x32xf32>, vector<8x32xf32> -> vector<8x32xf32>
    %c0_20 = arith.constant 0 : index
    %c0_21 = arith.constant 0 : index
    %17 = vector.load %arg10[%c0_20, %c0_21] : memref<1x32xf32, #tpu.memory_space<vmem>>, vector<1x32xf32>
    %18 = vector.broadcast %17 : vector<1x32xf32> to vector<8x32xf32>
    %19 = arith.addf %16, %18 : vector<8x32xf32>
    %20 = vector.extract_strided_slice %9 {offsets = [0, 0], sizes = [8, 8], strides = [1, 1]} : vector<8x32xf32> to vector<8x8xf32>
    %21 = vector.extract_strided_slice %14 {offsets = [0, 0], sizes = [8, 8], strides = [1, 1]} : vector<8x32xf32> to vector<8x8xf32>
    %22 = vector.extract_strided_slice %19 {offsets = [0, 0], sizes = [8, 8], strides = [1, 1]} : vector<8x32xf32> to vector<8x8xf32>
    %cst_22 = arith.constant dense<0.000000e+00> : vector<8x8xf32>
    %23 = tpu.matmul %20, %21, %cst_22 {dimension_numbers = #tpu.dot_dimension_numbers<[1], [1], [0], [0], [0, 0, 1, 0], [], []>} : vector<8x8xf32>, vector<8x8xf32>, vector<8x8xf32> -> vector<8x8xf32>
    %24 = vector.shape_cast %20 : vector<8x8xf32> to vector<8x1x8xf32>
    %25 = vector.broadcast %24 : vector<8x1x8xf32> to vector<8x8x8xf32>
    %26 = arith.mulf %25, %2 : vector<8x8x8xf32>
    %cst_23 = arith.constant dense<0.000000e+00> : vector<8x8xf32>
    %27 = vector.multi_reduction <add>, %26, %cst_23 [2] : vector<8x8x8xf32> to vector<8x8xf32>
    %28 = arith.addf %23, %27 : vector<8x8xf32>
    %cst_24 = arith.constant 0.353553385 : f32
    %29 = vector.broadcast %cst_24 : f32 to vector<8x8xf32>
    %30 = arith.mulf %28, %29 : vector<8x8xf32>
    %31 = vector.broadcast %4 : vector<1x8xf32> to vector<8x8xf32>
    %32 = arith.addf %30, %31 : vector<8x8xf32>
    %c0_25 = arith.constant 0 : index
    %c0_26 = arith.constant 0 : index
    %c0_27 = arith.constant 0 : index
    %c0_28 = arith.constant 0 : index
    %33 = vector.load %arg15[%c0_25, %c0_26, %c0_27, %c0_28] : memref<1x4x8x8xf32, #tpu.memory_space<vmem>>, vector<1x1x8x8xf32>
    %34 = vector.shape_cast %33 : vector<1x1x8x8xf32> to vector<8x8xf32>
    %35 = vector.shape_cast %32 : vector<8x8xf32> to vector<1x1x8x8xf32>
    tpu.vector_store %arg15[%c0_25, %c0_26, %c0_27, %c0_28], %35 {strides = array<i32>} : memref<1x4x8x8xf32, #tpu.memory_space<vmem>>, vector<1x1x8x8xf32>,
    %cst_29 = arith.constant dense<0xFF800000> : vector<8xf32>
    %36 = vector.multi_reduction <maximumf>, %32, %cst_29 [1] : vector<8x8xf32> to vector<8xf32>
    %37 = vector.shape_cast %36 : vector<8xf32> to vector<8x1xf32>
    %38 = vector.broadcast %37 : vector<8x1xf32> to vector<8x8xf32>
    %39 = arith.subf %32, %38 : vector<8x8xf32>
    %40 = math.exp %39 : vector<8x8xf32>
    %cst_30 = arith.constant dense<0.000000e+00> : vector<8xf32>
    %41 = vector.multi_reduction <add>, %40, %cst_30 [1] : vector<8x8xf32> to vector<8xf32>
    %42 = vector.shape_cast %41 : vector<8xf32> to vector<8x1xf32>
    %43 = tpu.reciprocal %42 : vector<8x1xf32> -> vector<8x1xf32>
    %44 = vector.broadcast %43 : vector<8x1xf32> to vector<8x8xf32>
    %45 = arith.mulf %40, %44 : vector<8x8xf32>
    %cst_31 = arith.constant dense<0.000000e+00> : vector<8x8xf32>
    %46 = tpu.matmul %45, %22, %cst_31 {dimension_numbers = #tpu.dot_dimension_numbers<[1], [0], [0], [1], [0, 0, 1, 1], [], []>} : vector<8x8xf32>, vector<8x8xf32>, vector<8x8xf32> -> vector<8x8xf32>
    %47 = vector.shape_cast %45 : vector<8x8xf32> to vector<8x8x1xf32>
    %48 = vector.broadcast %47 : vector<8x8x1xf32> to vector<8x8x8xf32>
    %49 = arith.mulf %48, %2 : vector<8x8x8xf32>
    %cst_32 = arith.constant dense<0.000000e+00> : vector<8x8xf32>
    %50 = vector.multi_reduction <add>, %49, %cst_32 [1] : vector<8x8x8xf32> to vector<8x8xf32>
    %51 = arith.addf %46, %50 : vector<8x8xf32>
    %52 = vector.extract_strided_slice %9 {offsets = [0, 8], sizes = [8, 8], strides = [1, 1]} : vector<8x32xf32> to vector<8x8xf32>
    %53 = vector.extract_strided_slice %14 {offsets = [0, 8], sizes = [8, 8], strides = [1, 1]} : vector<8x32xf32> to vector<8x8xf32>
    %54 = vector.extract_strided_slice %19 {offsets = [0, 8], sizes = [8, 8], strides = [1, 1]} : vector<8x32xf32> to vector<8x8xf32>
    %cst_33 = arith.constant dense<0.000000e+00> : vector<8x8xf32>
    %55 = tpu.matmul %52, %53, %cst_33 {dimension_numbers = #tpu.dot_dimension_numbers<[1], [1], [0], [0], [0, 0, 1, 0], [], []>} : vector<8x8xf32>, vector<8x8xf32>, vector<8x8xf32> -> vector<8x8xf32>
    %56 = vector.shape_cast %52 : vector<8x8xf32> to vector<8x1x8xf32>
    %57 = vector.broadcast %56 : vector<8x1x8xf32> to vector<8x8x8xf32>
    %58 = arith.mulf %57, %2 : vector<8x8x8xf32>
    %cst_34 = arith.constant dense<0.000000e+00> : vector<8x8xf32>
    %59 = vector.multi_reduction <add>, %58, %cst_34 [2] : vector<8x8x8xf32> to vector<8x8xf32>
    %60 = arith.addf %55, %59 : vector<8x8xf32>
    %cst_35 = arith.constant 0.353553385 : f32
    %61 = vector.broadcast %cst_35 : f32 to vector<8x8xf32>
    %62 = arith.mulf %60, %61 : vector<8x8xf32>
    %63 = vector.broadcast %4 : vector<1x8xf32> to vector<8x8xf32>
    %64 = arith.addf %62, %63 : vector<8x8xf32>
    %c0_36 = arith.constant 0 : index
    %c1 = arith.constant 1 : index
    %c0_37 = arith.constant 0 : index
    %c0_38 = arith.constant 0 : index
    %65 = vector.load %arg15[%c0_36, %c1, %c0_37, %c0_38] : memref<1x4x8x8xf32, #tpu.memory_space<vmem>>, vector<1x1x8x8xf32>
    %66 = vector.shape_cast %65 : vector<1x1x8x8xf32> to vector<8x8xf32>
    %67 = vector.shape_cast %64 : vector<8x8xf32> to vector<1x1x8x8xf32>
    tpu.vector_store %arg15[%c0_36, %c1, %c0_37, %c0_38], %67 {strides = array<i32>} : memref<1x4x8x8xf32, #tpu.memory_space<vmem>>, vector<1x1x8x8xf32>,
    %cst_39 = arith.constant dense<0xFF800000> : vector<8xf32>
    %68 = vector.multi_reduction <maximumf>, %64, %cst_39 [1] : vector<8x8xf32> to vector<8xf32>
    %69 = vector.shape_cast %68 : vector<8xf32> to vector<8x1xf32>
    %70 = vector.broadcast %69 : vector<8x1xf32> to vector<8x8xf32>
    %71 = arith.subf %64, %70 : vector<8x8xf32>
    %72 = math.exp %71 : vector<8x8xf32>
    %cst_40 = arith.constant dense<0.000000e+00> : vector<8xf32>
    %73 = vector.multi_reduction <add>, %72, %cst_40 [1] : vector<8x8xf32> to vector<8xf32>
    %74 = vector.shape_cast %73 : vector<8xf32> to vector<8x1xf32>
    %75 = tpu.reciprocal %74 : vector<8x1xf32> -> vector<8x1xf32>
    %76 = vector.broadcast %75 : vector<8x1xf32> to vector<8x8xf32>
    %77 = arith.mulf %72, %76 : vector<8x8xf32>
    %cst_41 = arith.constant dense<0.000000e+00> : vector<8x8xf32>
    %78 = tpu.matmul %77, %54, %cst_41 {dimension_numbers = #tpu.dot_dimension_numbers<[1], [0], [0], [1], [0, 0, 1, 1], [], []>} : vector<8x8xf32>, vector<8x8xf32>, vector<8x8xf32> -> vector<8x8xf32>
    %79 = vector.shape_cast %77 : vector<8x8xf32> to vector<8x8x1xf32>
    %80 = vector.broadcast %79 : vector<8x8x1xf32> to vector<8x8x8xf32>
    %81 = arith.mulf %80, %2 : vector<8x8x8xf32>
    %cst_42 = arith.constant dense<0.000000e+00> : vector<8x8xf32>
    %82 = vector.multi_reduction <add>, %81, %cst_42 [1] : vector<8x8x8xf32> to vector<8x8xf32>
    %83 = arith.addf %78, %82 : vector<8x8xf32>
    %84 = vector.extract_strided_slice %9 {offsets = [0, 16], sizes = [8, 8], strides = [1, 1]} : vector<8x32xf32> to vector<8x8xf32>
    %85 = vector.extract_strided_slice %14 {offsets = [0, 16], sizes = [8, 8], strides = [1, 1]} : vector<8x32xf32> to vector<8x8xf32>
    %86 = vector.extract_strided_slice %19 {offsets = [0, 16], sizes = [8, 8], strides = [1, 1]} : vector<8x32xf32> to vector<8x8xf32>
    %cst_43 = arith.constant dense<0.000000e+00> : vector<8x8xf32>
    %87 = tpu.matmul %84, %85, %cst_43 {dimension_numbers = #tpu.dot_dimension_numbers<[1], [1], [0], [0], [0, 0, 1, 0], [], []>} : vector<8x8xf32>, vector<8x8xf32>, vector<8x8xf32> -> vector<8x8xf32>
    %88 = vector.shape_cast %84 : vector<8x8xf32> to vector<8x1x8xf32>
    %89 = vector.broadcast %88 : vector<8x1x8xf32> to vector<8x8x8xf32>
    %90 = arith.mulf %89, %2 : vector<8x8x8xf32>
    %cst_44 = arith.constant dense<0.000000e+00> : vector<8x8xf32>
    %91 = vector.multi_reduction <add>, %90, %cst_44 [2] : vector<8x8x8xf32> to vector<8x8xf32>
    %92 = arith.addf %87, %91 : vector<8x8xf32>
    %cst_45 = arith.constant 0.353553385 : f32
    %93 = vector.broadcast %cst_45 : f32 to vector<8x8xf32>
    %94 = arith.mulf %92, %93 : vector<8x8xf32>
    %95 = vector.broadcast %4 : vector<1x8xf32> to vector<8x8xf32>
    %96 = arith.addf %94, %95 : vector<8x8xf32>
    %c0_46 = arith.constant 0 : index
    %c2 = arith.constant 2 : index
    %c0_47 = arith.constant 0 : index
    %c0_48 = arith.constant 0 : index
    %97 = vector.load %arg15[%c0_46, %c2, %c0_47, %c0_48] : memref<1x4x8x8xf32, #tpu.memory_space<vmem>>, vector<1x1x8x8xf32>
    %98 = vector.shape_cast %97 : vector<1x1x8x8xf32> to vector<8x8xf32>
    %99 = vector.shape_cast %96 : vector<8x8xf32> to vector<1x1x8x8xf32>
    tpu.vector_store %arg15[%c0_46, %c2, %c0_47, %c0_48], %99 {strides = array<i32>} : memref<1x4x8x8xf32, #tpu.memory_space<vmem>>, vector<1x1x8x8xf32>,
    %cst_49 = arith.constant dense<0xFF800000> : vector<8xf32>
    %100 = vector.multi_reduction <maximumf>, %96, %cst_49 [1] : vector<8x8xf32> to vector<8xf32>
    %101 = vector.shape_cast %100 : vector<8xf32> to vector<8x1xf32>
    %102 = vector.broadcast %101 : vector<8x1xf32> to vector<8x8xf32>
    %103 = arith.subf %96, %102 : vector<8x8xf32>
    %104 = math.exp %103 : vector<8x8xf32>
    %cst_50 = arith.constant dense<0.000000e+00> : vector<8xf32>
    %105 = vector.multi_reduction <add>, %104, %cst_50 [1] : vector<8x8xf32> to vector<8xf32>
    %106 = vector.shape_cast %105 : vector<8xf32> to vector<8x1xf32>
    %107 = tpu.reciprocal %106 : vector<8x1xf32> -> vector<8x1xf32>
    %108 = vector.broadcast %107 : vector<8x1xf32> to vector<8x8xf32>
    %109 = arith.mulf %104, %108 : vector<8x8xf32>
    %cst_51 = arith.constant dense<0.000000e+00> : vector<8x8xf32>
    %110 = tpu.matmul %109, %86, %cst_51 {dimension_numbers = #tpu.dot_dimension_numbers<[1], [0], [0], [1], [0, 0, 1, 1], [], []>} : vector<8x8xf32>, vector<8x8xf32>, vector<8x8xf32> -> vector<8x8xf32>
    %111 = vector.shape_cast %109 : vector<8x8xf32> to vector<8x8x1xf32>
    %112 = vector.broadcast %111 : vector<8x8x1xf32> to vector<8x8x8xf32>
    %113 = arith.mulf %112, %2 : vector<8x8x8xf32>
    %cst_52 = arith.constant dense<0.000000e+00> : vector<8x8xf32>
    %114 = vector.multi_reduction <add>, %113, %cst_52 [1] : vector<8x8x8xf32> to vector<8x8xf32>
    %115 = arith.addf %110, %114 : vector<8x8xf32>
    %116 = vector.extract_strided_slice %9 {offsets = [0, 24], sizes = [8, 8], strides = [1, 1]} : vector<8x32xf32> to vector<8x8xf32>
    %117 = vector.extract_strided_slice %14 {offsets = [0, 24], sizes = [8, 8], strides = [1, 1]} : vector<8x32xf32> to vector<8x8xf32>
    %118 = vector.extract_strided_slice %19 {offsets = [0, 24], sizes = [8, 8], strides = [1, 1]} : vector<8x32xf32> to vector<8x8xf32>
    %cst_53 = arith.constant dense<0.000000e+00> : vector<8x8xf32>
    %119 = tpu.matmul %116, %117, %cst_53 {dimension_numbers = #tpu.dot_dimension_numbers<[1], [1], [0], [0], [0, 0, 1, 0], [], []>} : vector<8x8xf32>, vector<8x8xf32>, vector<8x8xf32> -> vector<8x8xf32>
    %120 = vector.shape_cast %116 : vector<8x8xf32> to vector<8x1x8xf32>
    %121 = vector.broadcast %120 : vector<8x1x8xf32> to vector<8x8x8xf32>
    %122 = arith.mulf %121, %2 : vector<8x8x8xf32>
    %cst_54 = arith.constant dense<0.000000e+00> : vector<8x8xf32>
    %123 = vector.multi_reduction <add>, %122, %cst_54 [2] : vector<8x8x8xf32> to vector<8x8xf32>
    %124 = arith.addf %119, %123 : vector<8x8xf32>
    %cst_55 = arith.constant 0.353553385 : f32
    %125 = vector.broadcast %cst_55 : f32 to vector<8x8xf32>
    %126 = arith.mulf %124, %125 : vector<8x8xf32>
    %127 = vector.broadcast %4 : vector<1x8xf32> to vector<8x8xf32>
    %128 = arith.addf %126, %127 : vector<8x8xf32>
    %c0_56 = arith.constant 0 : index
    %c3 = arith.constant 3 : index
    %c0_57 = arith.constant 0 : index
    %c0_58 = arith.constant 0 : index
    %129 = vector.load %arg15[%c0_56, %c3, %c0_57, %c0_58] : memref<1x4x8x8xf32, #tpu.memory_space<vmem>>, vector<1x1x8x8xf32>
    %130 = vector.shape_cast %129 : vector<1x1x8x8xf32> to vector<8x8xf32>
    %131 = vector.shape_cast %128 : vector<8x8xf32> to vector<1x1x8x8xf32>
    tpu.vector_store %arg15[%c0_56, %c3, %c0_57, %c0_58], %131 {strides = array<i32>} : memref<1x4x8x8xf32, #tpu.memory_space<vmem>>, vector<1x1x8x8xf32>,
    %cst_59 = arith.constant dense<0xFF800000> : vector<8xf32>
    %132 = vector.multi_reduction <maximumf>, %128, %cst_59 [1] : vector<8x8xf32> to vector<8xf32>
    %133 = vector.shape_cast %132 : vector<8xf32> to vector<8x1xf32>
    %134 = vector.broadcast %133 : vector<8x1xf32> to vector<8x8xf32>
    %135 = arith.subf %128, %134 : vector<8x8xf32>
    %136 = math.exp %135 : vector<8x8xf32>
    %cst_60 = arith.constant dense<0.000000e+00> : vector<8xf32>
    %137 = vector.multi_reduction <add>, %136, %cst_60 [1] : vector<8x8xf32> to vector<8xf32>
    %138 = vector.shape_cast %137 : vector<8xf32> to vector<8x1xf32>
    %139 = tpu.reciprocal %138 : vector<8x1xf32> -> vector<8x1xf32>
    %140 = vector.broadcast %139 : vector<8x1xf32> to vector<8x8xf32>
    %141 = arith.mulf %136, %140 : vector<8x8xf32>
    %cst_61 = arith.constant dense<0.000000e+00> : vector<8x8xf32>
    %142 = tpu.matmul %141, %118, %cst_61 {dimension_numbers = #tpu.dot_dimension_numbers<[1], [0], [0], [1], [0, 0, 1, 1], [], []>} : vector<8x8xf32>, vector<8x8xf32>, vector<8x8xf32> -> vector<8x8xf32>
    %143 = vector.shape_cast %141 : vector<8x8xf32> to vector<8x8x1xf32>
    %144 = vector.broadcast %143 : vector<8x8x1xf32> to vector<8x8x8xf32>
    %145 = arith.mulf %144, %2 : vector<8x8x8xf32>
    %cst_62 = arith.constant dense<0.000000e+00> : vector<8x8xf32>
    %146 = vector.multi_reduction <add>, %145, %cst_62 [1] : vector<8x8x8xf32> to vector<8x8xf32>
    %147 = arith.addf %142, %146 : vector<8x8xf32>
    %148 = tpu.concatenate %51, %83, %115, %147 in 1 : vector<8x8xf32>, vector<8x8xf32>, vector<8x8xf32>, vector<8x8xf32> -> vector<8x32xf32>
    %c0_63 = arith.constant 0 : index
    %c0_64 = arith.constant 0 : index
    %149 = vector.load %arg7[%c0_63, %c0_64] : memref<32x32xf32, #tpu.memory_space<vmem>>, vector<32x32xf32>
    %cst_65 = arith.constant dense<0.000000e+00> : vector<8x32xf32>
    %150 = tpu.matmul %148, %149, %cst_65 {dimension_numbers = #tpu.dot_dimension_numbers<[1], [0], [0], [1], [0, 0, 1, 1], [], []>} : vector<8x32xf32>, vector<32x32xf32>, vector<8x32xf32> -> vector<8x32xf32>
    %c0_66 = arith.constant 0 : index
    %c0_67 = arith.constant 0 : index
    %151 = vector.load %arg11[%c0_66, %c0_67] : memref<1x32xf32, #tpu.memory_space<vmem>>, vector<1x32xf32>
    %152 = vector.broadcast %151 : vector<1x32xf32> to vector<8x32xf32>
    %153 = arith.addf %150, %152 : vector<8x32xf32>
    %154 = arith.addf %153, %1 : vector<8x32xf32>
    %cst_68 = arith.constant dense<0.000000e+00> : vector<8xf32>
    %155 = vector.multi_reduction <add>, %154, %cst_68 [1] : vector<8x32xf32> to vector<8xf32>
    %156 = vector.shape_cast %155 : vector<8xf32> to vector<8x1xf32>
    %cst_69 = arith.constant 3.200000e+01 : f32
    %157 = vector.broadcast %cst_69 : f32 to vector<8x1xf32>
    %158 = arith.divf %156, %157 : vector<8x1xf32>
    %159 = vector.broadcast %158 : vector<8x1xf32> to vector<8x32xf32>
    %160 = arith.subf %154, %159 : vector<8x32xf32>
    %161 = arith.mulf %160, %160 : vector<8x32xf32>
    %cst_70 = arith.constant dense<0.000000e+00> : vector<8xf32>
    %162 = vector.multi_reduction <add>, %161, %cst_70 [1] : vector<8x32xf32> to vector<8xf32>
    %163 = vector.shape_cast %162 : vector<8xf32> to vector<8x1xf32>
    %cst_71 = arith.constant 3.200000e+01 : f32
    %164 = vector.broadcast %cst_71 : f32 to vector<8x1xf32>
    %165 = arith.divf %163, %164 : vector<8x1xf32>
    %cst_72 = arith.constant 9.99999996E-13 : f32
    %166 = vector.broadcast %cst_72 : f32 to vector<8x1xf32>
    %167 = arith.addf %165, %166 : vector<8x1xf32>
    %168 = math.rsqrt %167 : vector<8x1xf32>
    %c0_73 = arith.constant 0 : index
    %c0_74 = arith.constant 0 : index
    %169 = vector.load %arg12[%c0_73, %c0_74] : memref<1x32xf32, #tpu.memory_space<vmem>>, vector<1x32xf32>
    %170 = vector.broadcast %169 : vector<1x32xf32> to vector<8x32xf32>
    %171 = vector.broadcast %168 : vector<8x1xf32> to vector<8x32xf32>
    %172 = arith.mulf %170, %171 : vector<8x32xf32>
    %173 = arith.mulf %160, %172 : vector<8x32xf32>
    %c0_75 = arith.constant 0 : index
    %c0_76 = arith.constant 0 : index
    %174 = vector.load %arg13[%c0_75, %c0_76] : memref<1x32xf32, #tpu.memory_space<vmem>>, vector<1x32xf32>
    %175 = vector.broadcast %174 : vector<1x32xf32> to vector<8x32xf32>
    %176 = arith.addf %173, %175 : vector<8x32xf32>
    %c0_77 = arith.constant 0 : index
    %c0_78 = arith.constant 0 : index
    %c0_79 = arith.constant 0 : index
    %177 = vector.load %arg14[%c0_77, %c0_78, %c0_79] : memref<1x8x32xf32, #tpu.memory_space<vmem>>, vector<1x8x32xf32>
    %178 = vector.shape_cast %177 : vector<1x8x32xf32> to vector<8x32xf32>
    %179 = vector.shape_cast %176 : vector<8x32xf32> to vector<1x8x32xf32>
    tpu.vector_store %arg14[%c0_77, %c0_78, %c0_79], %179 {strides = array<i32>} : memref<1x8x32xf32, #tpu.memory_space<vmem>>, vector<1x8x32xf32>,
    return
  }
  func.func @transform_0(%arg0: i32) -> (i32, i32, i32) {
    %c0_i32 = arith.constant 0 : i32
    %c0_i32_0 = arith.constant 0 : i32
    %c0_i32_1 = arith.constant 0 : i32
    return %arg0, %c0_i32, %c0_i32_0 : i32, i32, i32
  }
  func.func @transform_1(%arg0: i32) -> (i32, i32, i32) {
    %c0_i32 = arith.constant 0 : i32
    %c0_i32_0 = arith.constant 0 : i32
    %c0_i32_1 = arith.constant 0 : i32
    return %arg0, %c0_i32, %c0_i32_0 : i32, i32, i32
  }
  func.func @transform_2(%arg0: i32) -> (i32, i32, i32) {
    %c0_i32 = arith.constant 0 : i32
    %c0_i32_0 = arith.constant 0 : i32
    %c0_i32_1 = arith.constant 0 : i32
    %c0_i32_2 = arith.constant 0 : i32
    return %c0_i32, %c0_i32_0, %c0_i32_1 : i32, i32, i32
  }
  func.func @transform_3(%arg0: i32) -> (i32, i32) {
    %c0_i32 = arith.constant 0 : i32
    %c0_i32_0 = arith.constant 0 : i32
    %c0_i32_1 = arith.constant 0 : i32
    return %c0_i32, %c0_i32_0 : i32, i32
  }
  func.func @transform_4(%arg0: i32) -> (i32, i32) {
    %c0_i32 = arith.constant 0 : i32
    %c0_i32_0 = arith.constant 0 : i32
    %c0_i32_1 = arith.constant 0 : i32
    return %c0_i32, %c0_i32_0 : i32, i32
  }
  func.func @transform_5(%arg0: i32) -> (i32, i32) {
    %c0_i32 = arith.constant 0 : i32
    %c0_i32_0 = arith.constant 0 : i32
    %c0_i32_1 = arith.constant 0 : i32
    return %c0_i32, %c0_i32_0 : i32, i32
  }
  func.func @transform_6(%arg0: i32) -> (i32, i32) {
    %c0_i32 = arith.constant 0 : i32
    %c0_i32_0 = arith.constant 0 : i32
    %c0_i32_1 = arith.constant 0 : i32
    return %c0_i32, %c0_i32_0 : i32, i32
  }
  func.func @transform_7(%arg0: i32) -> (i32, i32) {
    %c0_i32 = arith.constant 0 : i32
    %c0_i32_0 = arith.constant 0 : i32
    %c0_i32_1 = arith.constant 0 : i32
    return %c0_i32, %c0_i32_0 : i32, i32
  }
  func.func @transform_8(%arg0: i32) -> (i32, i32) {
    %c0_i32 = arith.constant 0 : i32
    %c0_i32_0 = arith.constant 0 : i32
    %c0_i32_1 = arith.constant 0 : i32
    return %c0_i32, %c0_i32_0 : i32, i32
  }
  func.func @transform_9(%arg0: i32) -> (i32, i32) {
    %c0_i32 = arith.constant 0 : i32
    %c0_i32_0 = arith.constant 0 : i32
    %c0_i32_1 = arith.constant 0 : i32
    return %c0_i32, %c0_i32_0 : i32, i32
  }
  func.func @transform_10(%arg0: i32) -> (i32, i32) {
    %c0_i32 = arith.constant 0 : i32
    %c0_i32_0 = arith.constant 0 : i32
    %c0_i32_1 = arith.constant 0 : i32
    return %c0_i32, %c0_i32_0 : i32, i32
  }
  func.func @transform_11(%arg0: i32) -> (i32, i32) {
    %c0_i32 = arith.constant 0 : i32
    %c0_i32_0 = arith.constant 0 : i32
    %c0_i32_1 = arith.constant 0 : i32
    return %c0_i32, %c0_i32_0 : i32, i32
  }
  func.func @transform_12(%arg0: i32) -> (i32, i32) {
    %c0_i32 = arith.constant 0 : i32
    %c0_i32_0 = arith.constant 0 : i32
    %c0_i32_1 = arith.constant 0 : i32
    return %c0_i32, %c0_i32_0 : i32, i32
  }
  func.func @transform_13(%arg0: i32) -> (i32, i32, i32) {
    %c0_i32 = arith.constant 0 : i32
    %c0_i32_0 = arith.constant 0 : i32
    %c0_i32_1 = arith.constant 0 : i32
    return %arg0, %c0_i32, %c0_i32_0 : i32, i32, i32
  }
  func.func @transform_14(%arg0: i32) -> (i32, i32, i32, i32) {
    %c0_i32 = arith.constant 0 : i32
    %c0_i32_0 = arith.constant 0 : i32
    %c0_i32_1 = arith.constant 0 : i32
    %c0_i32_2 = arith.constant 0 : i32
    return %arg0, %c0_i32, %c0_i32_0, %c0_i32_1 : i32, i32, i32, i32
  }
}

</mosaic_0001>

<bundles_post_ra>
// kernel: tpu_custom_call.1
= control target key start
LH: loop header
LB: loop body
LE: loop exit
PB: predicated region body
PF: predicated region fallthrough
CT: control target
= control target key end

     0   :  { %s5272_s0 = inlined_call_operand.hbm [shape: f32[2,8,32], index: 0, kind: input, shape index: {}]   ;;  %s5273_s1 = inlined_call_operand.hbm [shape: f32[2,1,8], index: 1, kind: input, shape index: {}]   ;;  %s5274_s2 = inlined_call_operand.hbm [shape: f32[8,8,8], index: 2, kind: input, shape index: {}]   ;;  %s5275_s3 = inlined_call_operand.hbm [shape: f32[32,32], index: 3, kind: input, shape index: {}]   ;;  %s5276_s4 = inlined_call_operand.hbm [shape: f32[32,32], index: 4, kind: input, shape index: {}]   ;;  %s5277_s5 = inlined_call_operand.hbm [shape: f32[32,32], index: 5, kind: input, shape index: {}]   ;;  %s5278_s6 = inlined_call_operand.hbm [shape: f32[32,32], index: 6, kind: input, shape index: {}]   ;;  %s5279_s7 = inlined_call_operand.hbm [shape: f32[1,32], index: 7, kind: input, shape index: {}]   ;;  %s5280_s8 = inlined_call_operand.hbm [shape: f32[1,32], index: 8, kind: input, shape index: {}]   ;;  %s5281_s9 = inlined_call_operand.hbm [shape: f32[1,32], index: 9, kind: input, shape index: {}]   ;;  %s5282_s10 = inlined_call_operand.hbm [shape: f32[1,32], index: 10, kind: input, shape index: {}]   ;;  %s5283_s11 = inlined_call_operand.hbm [shape: f32[1,32], index: 11, kind: input, shape index: {}]   ;;  %s5284_s12 = inlined_call_operand.hbm [shape: f32[1,32], index: 12, kind: input, shape index: {}]   ;;  %s5285_s13 = inlined_call_operand.hbm [shape: f32[2,8,32], index: 13, kind: output, shape index: {0}]   ;;  %s5286_s14 = inlined_call_operand.hbm [shape: f32[2,4,8,8], index: 14, kind: output, shape index: {1}]  }
   0x1   :  { %5302 = sst [smem:[#allocation38_spill]] %s5272_s0 }
   0x2   :  { %5303 = sst [smem:[#allocation39_spill]] %s5273_s1 }
   0x3   :  { %5304 = sst [smem:[#allocation40_spill]] %s5274_s2 }
   0x4   :  { %5305 = sst [smem:[#allocation41_spill]] %s5275_s3 }
   0x5   :  { %5306 = sst [smem:[#allocation42_spill]] %s5276_s4 }
   0x6   :  { %5307 = sst [smem:[#allocation43_spill]] %s5277_s5 }
   0x7   :  { %5308 = sst [smem:[#allocation44_spill]] %s5285_s13 }
   0x8   :  { %5309 = sst [smem:[#allocation45_spill]] %s5286_s14 }
   0x9   :  { %20 = vsyncpa [#allocation3], 0 }
   0xa   :  { %22 = vsyncpa [#allocation3 + $0x1], 0 }
   0xb   :  { %23 = vsyncpa [#allocation6], 0 }
   0xc   :  { %25 = vsyncpa [#allocation6 + $0x1], 0 }
   0xd   :  { %26 = vsyncpa [#allocation9], 0 }
   0xe   :  { %27 = vsyncpa [#allocation12], 0 }
   0xf   :  { %28 = vsyncpa [#allocation15], 0 }
  0x10   :  { %29 = vsyncpa [#allocation18], 0 }
  0x11   :  { %30 = vsyncpa [#allocation21], 0 }
  0x12   :  { %31 = vsyncpa [#allocation4], 0 }
  0x13   :  { %33 = vsyncpa [#allocation4 + $0x1], 0 }
  0x14   :  { %34 = vsyncpa [#allocation25], 0 }
  0x15   :  { %36 = vsyncpa [#allocation25 + $0x1], 0  ;;  %s4158_s29 = smov 0   ;;  %s4160_s30 = smov 0  }
  0x16   :  { %s4162_s15 = smov 0   ;;  %s4164_s16 = smov 0  }
  0x17 LB: > { %s4055_s17 = smov [#allocation7]   ;;  %s4179_s19 = sadd.s32 4294967295, %s4053_s16   ;;  %s4053_s16 = sphi %s4164_s16, %s5355_s16   ;;  %s4049_s15 = sphi %s4162_s15, %s5354_s15   ;;  %s4045_s30 = sphi %s4160_s30, %s5353_s30   ;;  %s4041_s29 = sphi %s4158_s29, %s5352_s29  }
  0x18   : > { %s394_s18 = sshll.u32 %s4055_s17, 4  ;;  %5310 = sst [smem:[#allocation36_spill]] %s4179_s19  ;;  %s4184_s18 = int_to_ptr.vmem [resolvable:$true] %s394_s18 }
  0x19   : > { %p3143_p0 = scmp.ge.s32.totalorder %s4053_s16, 1  ;;  %p5295_p1 = scmp.eq.s32.totalorder %s4179_s19, 0 }
  0x1a   : > { %p382_p2 = scmp.lt.s32.totalorder %s4053_s16, 3  ;;  %s4056_s21 = smov [#allocation8]  }
  0x1b   : > { %s407_s22 = sshll.u32 %s4056_s21, 4  ;;  %s4057_s24 = smov [#allocation11]   ;;  %s4199_s22 = int_to_ptr.vmem [resolvable:$true] %s407_s22 }
  0x1c   : > { %p4186_p3 = pnand %p3143_p0, %p382_p2  ;;  %s433_s25 = sshll.u32 %s4057_s24, 4  ;;  %s4201_s25 = int_to_ptr.vmem [resolvable:$true] %s433_s25 }
  0x1d   : > { %s5314_s2 = sld [smem:[#allocation40_spill]] }
  0x1e   : > { %s5311_s20 = scalar_select %p4186_p3, 1, 0 }
  0x1f   : > { %p3404_p5 = pneg %p4186_p3 }
  0x20   : > { %5312 = sst [smem:[#allocation37_spill]] %s5311_s20 }
  0x21   : > { %p4195_p6 = pnand %p3404_p5, %p5295_p1 }
  0x23   : > { %s3559_s28 = scalar_lea.hbm %s5314_s2, 1024  ;;  %p4211_p8 = pneg %p4195_p6 }
  0x24   : > { %p3560_p7 = scmp.ne.s32.totalorder %s5314_s2, %s3559_s28  ;;  %p3566_p11 = scmp.lt.u32.totalorder %s3559_s28, %s5314_s2 }
  0x26   : > { %p3562_p9 = pnand %p4211_p8, %p3560_p7 }
  0x28   : > { %p3563_p10 = pneg %p3562_p9 }
  0x2a   : > { %p3568_p12 = pnand %p3566_p11, %p3563_p10 }
  0x2c   : > { %3571 = shalt.err (!%p3568_p12)
}
  0x2d   : > { %s3572_s13 = scalar_lea.vmem %s4184_s18, 1024  ;;  %p3580_p5 = scmp.lt.s32.totalorder %s4184_s18, %s4184_s18 }
  0x2e   : > { %p3573_p13 = scmp.ne.s32.totalorder %s4184_s18, %s3572_s13  ;;  %p3581_p4 = scmp.lt.s32.totalorder %s3572_s13, %s3572_s13 }
  0x30   : > { %p3575_p0 = pnand %p3573_p13, %p4211_p8  ;;  %p3582_p7 = por %p3581_p4, %p3580_p5 }
  0x32   : > { %p3576_p2 = pneg %p3575_p0 }
  0x34   : > { %p3583_p9 = pnand %p3582_p7, %p3576_p2 }
  0x36   : > { %3586 = shalt.err (!%p3583_p9)
}
  0x37   : > { %s4058_s26 = smov 128   ;;  %s4059_s14 = smov 8  }
  0x38   : > { %3407 = dma.hbm_to_vmem [thread:$0]  (!%p4195_p6), %s5314_s2, 1024, %s4184_s18, [#allocation6], %s4058_s26, %s4058_s26, %s4059_s14  }
  0x39   : > { %s5316_s3 = sld [smem:[#allocation41_spill]] }
  0x3f   : > { %s3587_s13 = scalar_lea.hbm %s5316_s3, 512 }
  0x40   : > { %p3588_p4 = scmp.ne.s32.totalorder %s5316_s3, %s3587_s13  ;;  %p3594_p12 = scmp.lt.u32.totalorder %s3587_s13, %s5316_s3 }
  0x42   : > { %p3590_p10 = pnand %p3588_p4, %p4211_p8 }
  0x44   : > { %p3591_p11 = pneg %p3590_p10 }
  0x46   : > { %p3596_p13 = pnand %p3594_p12, %p3591_p11 }
  0x48   : > { %3599 = shalt.err (!%p3596_p13)
}
  0x49   : > { %s3600_s18 = scalar_lea.vmem %s4199_s22, 512  ;;  %p3608_p7 = scmp.lt.s32.totalorder %s4199_s22, %s4199_s22 }
  0x4a   : > { %p3601_p0 = scmp.ne.s32.totalorder %s4199_s22, %s3600_s18  ;;  %p3609_p9 = scmp.lt.s32.totalorder %s3600_s18, %s3600_s18 }
  0x4c   : > { %p3603_p2 = pnand %p3601_p0, %p4211_p8  ;;  %p3610_p4 = por %p3609_p9, %p3608_p7 }
  0x4e   : > { %p3604_p5 = pneg %p3603_p2 }
  0x50   : > { %p3611_p10 = pnand %p3610_p4, %p3604_p5 }
  0x52   : > { %3614 = shalt.err (!%p3611_p10)
}
  0x53   : > { %3410 = dma.hbm_to_vmem [thread:$0]  (!%p4195_p6), %s5316_s3, 512, %s4199_s22, [#allocation9], %s4058_s26, %s4058_s26, %s4059_s14  }
  0x54   : > { %s5317_s5 = sld [smem:[#allocation43_spill]] }
  0x5a   : > { %s3615_s27 = scalar_lea.hbm %s5317_s5, 512 }
  0x5b   : > { %p3616_p11 = scmp.ne.s32.totalorder %s5317_s5, %s3615_s27  ;;  %p3622_p0 = scmp.lt.u32.totalorder %s3615_s27, %s5317_s5 }
  0x5d   : > { %p3618_p12 = pnand %p3616_p11, %p4211_p8 }
  0x5f   : > { %p3619_p13 = pneg %p3618_p12 }
  0x61   : > { %p3624_p2 = pnand %p3622_p0, %p3619_p13 }
  0x63   : > { %3627 = shalt.err (!%p3624_p2)
}
  0x64   : > { %s3628_s22 = scalar_lea.vmem %s4201_s25, 512  ;;  %p3636_p4 = scmp.lt.s32.totalorder %s4201_s25, %s4201_s25 }
  0x65   : > { %p3629_p5 = scmp.ne.s32.totalorder %s4201_s25, %s3628_s22  ;;  %p3637_p10 = scmp.lt.s32.totalorder %s3628_s22, %s3628_s22 }
  0x67   : > { %p3631_p7 = pnand %p3629_p5, %p4211_p8  ;;  %p3638_p11 = por %p3637_p10, %p3636_p4 }
  0x69   : > { %p3632_p9 = pneg %p3631_p7 }
  0x6b   : > { %p3639_p12 = pnand %p3638_p11, %p3632_p9 }
  0x6d   : > { %3642 = shalt.err (!%p3639_p12)
}
  0x6e   : > { %3416 = dma.hbm_to_vmem [thread:$0]  (!%p4195_p6), %s5317_s5, 512, %s4201_s25, [#allocation12], %s4058_s26, %s4058_s26, %s4059_s14  }
  0x6f   : > { %s4060_s1 = smov [#allocation14]   ;;  %s4061_s20 = smov [#allocation17]  }
  0x70   : > { %s460_s19 = sshll.u32 %s4060_s1, 4  ;;  %s482_s27 = sshll.u32 %s4061_s20, 4  ;;  %s461_s19 = int_to_ptr.vmem [resolvable:$true] %s460_s19  ;;  %s483_s27 = int_to_ptr.vmem [resolvable:$true] %s482_s27 }
  0x71   : > { %s3643_s24 = scalar_lea.hbm %s5279_s7, 16 }
  0x72   : > { %p3644_p13 = scmp.ne.s32.totalorder %s5279_s7, %s3643_s24  ;;  %p3650_p5 = scmp.lt.u32.totalorder %s3643_s24, %s5279_s7 }
  0x74   : > { %p3646_p0 = pnand %p3644_p13, %p4211_p8 }
  0x76   : > { %p3647_p2 = pneg %p3646_p0 }
  0x78   : > { %p3652_p7 = pnand %p3650_p5, %p3647_p2 }
  0x7a   : > { %3655 = shalt.err (!%p3652_p7)
}
  0x7b   : > { %s3656_s25 = scalar_lea.vmem %s461_s19, 16  ;;  %s3663_s0 = scalar_lea.vmem %s461_s19, 32 }
  0x7c   : > { %p3657_p9 = scmp.ne.s32.totalorder %s461_s19, %s3656_s25  ;;  %p3664_p11 = scmp.lt.s32.totalorder %s461_s19, %s461_s19 }
  0x7d   : > { %p3665_p12 = scmp.lt.s32.totalorder %s3663_s0, %s3656_s25 }
  0x7e   : > { %p3659_p4 = pnand %p3657_p9, %p4211_p8 }
  0x7f   : > { %p3666_p1 = por %p3665_p12, %p3664_p11 }
  0x80   : > { %p3660_p10 = pneg %p3659_p4 }
  0x82   : > { %p3667_p3 = pnand %p3666_p1, %p3660_p10 }
  0x84   : > { %3670 = shalt.err (!%p3667_p3)
}
  0x85   : > { %3422 = dma.hbm_to_vmem [thread:$0]  (!%p4195_p6), %s5279_s7, 16, %s461_s19, [#allocation15]  }
  0x86   : > { %s3671_s17 = scalar_lea.hbm %s5281_s9, 16 }
  0x87   : > { %p3672_p13 = scmp.ne.s32.totalorder %s5281_s9, %s3671_s17  ;;  %p3678_p3 = scmp.lt.u32.totalorder %s3671_s17, %s5281_s9 }
  0x89   : > { %p3674_p0 = pnand %p3672_p13, %p4211_p8 }
  0x8b   : > { %p3675_p1 = pneg %p3674_p0 }
  0x8d   : > { %p3680_p2 = pnand %p3678_p3, %p3675_p1 }
  0x8f   : > { %3683 = shalt.err (!%p3680_p2)
}
  0x90   : > { %s3684_s25 = scalar_lea.vmem %s483_s27, 16  ;;  %s3691_s19 = scalar_lea.vmem %s483_s27, 32 }
  0x91   : > { %p3685_p5 = scmp.ne.s32.totalorder %s483_s27, %s3684_s25  ;;  %p3692_p4 = scmp.lt.s32.totalorder %s483_s27, %s483_s27 }
  0x92   : > { %p3693_p10 = scmp.lt.s32.totalorder %s3691_s19, %s3684_s25 }
  0x93   : > { %p3687_p7 = pnand %p3685_p5, %p4211_p8 }
  0x94   : > { %p3694_p11 = por %p3693_p10, %p3692_p4 }
  0x95   : > { %p3688_p9 = pneg %p3687_p7 }
  0x97   : > { %p3695_p12 = pnand %p3694_p11, %p3688_p9 }
  0x99   : > { %3698 = shalt.err (!%p3695_p12)
}
  0x9a   : > { %3428 = dma.hbm_to_vmem [thread:$0]  (!%p4195_p6), %s5281_s9, 16, %s483_s27, [#allocation18]  }
  0x9b   : > { %s4062_s20 = smov [#allocation20]   ;;  %s4063_s28 = smov [#allocation10]  }
  0x9c   : > { %s504_s2 = sshll.u32 %s4062_s20, 4  ;;  %s420_s17 = sshll.u32 %s4063_s28, 4  ;;  %s505_s2 = int_to_ptr.vmem [resolvable:$true] %s504_s2  ;;  %s421_s17 = int_to_ptr.vmem [resolvable:$true] %s420_s17 }
  0x9d   : > { %s3699_s22 = scalar_lea.hbm %s5283_s11, 16 }
  0x9e   : > { %p3700_p13 = scmp.ne.s32.totalorder %s5283_s11, %s3699_s22  ;;  %p3706_p3 = scmp.lt.u32.totalorder %s3699_s22, %s5283_s11 }
  0xa0   : > { %p3702_p0 = pnand %p3700_p13, %p4211_p8 }
  0xa2   : > { %p3703_p1 = pneg %p3702_p0 }
  0xa4   : > { %p3708_p2 = pnand %p3706_p3, %p3703_p1 }
  0xa6   : > { %3711 = shalt.err (!%p3708_p2)
}
  0xa7   : > { %s3712_s27 = scalar_lea.vmem %s505_s2, 16  ;;  %s3719_s1 = scalar_lea.vmem %s505_s2, 32 }
  0xa8   : > { %p3713_p5 = scmp.ne.s32.totalorder %s505_s2, %s3712_s27  ;;  %p3720_p4 = scmp.lt.s32.totalorder %s505_s2, %s505_s2 }
  0xa9   : > { %p3721_p10 = scmp.lt.s32.totalorder %s3719_s1, %s3712_s27 }
  0xaa   : > { %p3715_p7 = pnand %p3713_p5, %p4211_p8 }
  0xab   : > { %p3722_p11 = por %p3721_p10, %p3720_p4 }
  0xac   : > { %p3716_p9 = pneg %p3715_p7 }
  0xae   : > { %p3723_p12 = pnand %p3722_p11, %p3716_p9 }
  0xb0   : > { %3726 = shalt.err (!%p3723_p12)
}
  0xb1   : > { %3434 = dma.hbm_to_vmem [thread:$0]  (!%p4195_p6), %s5283_s11, 16, %s505_s2, [#allocation21]  }
  0xb2   : > { %s5318_s4 = sld [smem:[#allocation42_spill]] }
  0xb8   : > { %s3727_s22 = scalar_lea.hbm %s5318_s4, 512 }
  0xb9   : > { %p3728_p13 = scmp.ne.s32.totalorder %s5318_s4, %s3727_s22  ;;  %p3734_p3 = scmp.lt.u32.totalorder %s3727_s22, %s5318_s4 }
  0xbb   : > { %p3730_p0 = pnand %p3728_p13, %p4211_p8 }
  0xbd   : > { %p3731_p1 = pneg %p3730_p0 }
  0xbf   : > { %p3736_p2 = pnand %p3734_p3, %p3731_p1 }
  0xc1   : > { %3739 = shalt.err (!%p3736_p2)
}
  0xc2   : > { %s3740_s27 = scalar_lea.vmem %s421_s17, 512  ;;  %p3748_p4 = scmp.lt.s32.totalorder %s421_s17, %s421_s17 }
  0xc3   : > { %p3741_p5 = scmp.ne.s32.totalorder %s421_s17, %s3740_s27  ;;  %p3749_p10 = scmp.lt.s32.totalorder %s3740_s27, %s3740_s27 }
  0xc5   : > { %p3743_p7 = pnand %p3741_p5, %p4211_p8  ;;  %p3750_p11 = por %p3749_p10, %p3748_p4 }
  0xc7   : > { %p3744_p9 = pneg %p3743_p7 }
  0xc9   : > { %p3751_p12 = pnand %p3750_p11, %p3744_p9 }
  0xcb   : > { %3754 = shalt.err (!%p3751_p12)
}
  0xcc   : > { %3413 = dma.hbm_to_vmem [thread:$0]  (!%p4195_p6), %s5318_s4, 512, %s421_s17, [#allocation9], %s4058_s26, %s4058_s26, %s4059_s14  }
  0xcd   : > { %s4064_s20 = smov [#allocation13]   ;;  %s4065_s24 = smov [#allocation16]  }
  0xce   : > { %s446_s28 = sshll.u32 %s4064_s20, 4  ;;  %s471_s13 = sshll.u32 %s4065_s24, 4  ;;  %s447_s28 = int_to_ptr.vmem [resolvable:$true] %s446_s28  ;;  %s472_s13 = int_to_ptr.vmem [resolvable:$true] %s471_s13 }
  0xcf   : > { %s3755_s25 = scalar_lea.hbm %s5278_s6, 512 }
  0xd0   : > { %p3756_p13 = scmp.ne.s32.totalorder %s5278_s6, %s3755_s25  ;;  %p3762_p3 = scmp.lt.u32.totalorder %s3755_s25, %s5278_s6 }
  0xd2   : > { %p3758_p0 = pnand %p3756_p13, %p4211_p8 }
  0xd4   : > { %p3759_p1 = pneg %p3758_p0 }
  0xd6   : > { %p3764_p2 = pnand %p3762_p3, %p3759_p1 }
  0xd8   : > { %3767 = shalt.err (!%p3764_p2)
}
  0xd9   : > { %s3768_s17 = scalar_lea.vmem %s447_s28, 512  ;;  %p3776_p4 = scmp.lt.s32.totalorder %s447_s28, %s447_s28 }
  0xda   : > { %p3769_p5 = scmp.ne.s32.totalorder %s447_s28, %s3768_s17  ;;  %p3777_p10 = scmp.lt.s32.totalorder %s3768_s17, %s3768_s17 }
  0xdc   : > { %p3771_p7 = pnand %p3769_p5, %p4211_p8  ;;  %p3778_p11 = por %p3777_p10, %p3776_p4 }
  0xde   : > { %p3772_p9 = pneg %p3771_p7 }
  0xe0   : > { %p3779_p12 = pnand %p3778_p11, %p3772_p9 }
  0xe2   : > { %3782 = shalt.err (!%p3779_p12)
}
  0xe3   : > { %3419 = dma.hbm_to_vmem [thread:$0]  (!%p4195_p6), %s5278_s6, 512, %s447_s28, [#allocation12], %s4058_s26, %s4058_s26, %s4059_s14  }
  0xe4   : > { %s3783_s18 = scalar_lea.hbm %s5280_s8, 16 }
  0xe5   : > { %p3784_p13 = scmp.ne.s32.totalorder %s5280_s8, %s3783_s18  ;;  %p3790_p3 = scmp.lt.u32.totalorder %s3783_s18, %s5280_s8 }
  0xe7   : > { %p3786_p0 = pnand %p3784_p13, %p4211_p8 }
  0xe9   : > { %p3787_p1 = pneg %p3786_p0 }
  0xeb   : > { %p3792_p2 = pnand %p3790_p3, %p3787_p1 }
  0xed   : > { %3795 = shalt.err (!%p3792_p2)
}
  0xee   : > { %s3796_s2 = scalar_lea.vmem %s472_s13, 16  ;;  %s3803_s26 = scalar_lea.vmem %s472_s13, 32 }
  0xef   : > { %p3797_p5 = scmp.ne.s32.totalorder %s472_s13, %s3796_s2  ;;  %p3804_p4 = scmp.lt.s32.totalorder %s472_s13, %s472_s13 }
  0xf0   : > { %p3805_p10 = scmp.lt.s32.totalorder %s3803_s26, %s3796_s2 }
  0xf1   : > { %p3799_p7 = pnand %p3797_p5, %p4211_p8 }
  0xf2   : > { %p3806_p11 = por %p3805_p10, %p3804_p4 }
  0xf3   : > { %p3800_p9 = pneg %p3799_p7 }
  0xf5   : > { %p3807_p12 = pnand %p3806_p11, %p3800_p9 }
  0xf7   : > { %3810 = shalt.err (!%p3807_p12)
}
  0xf8   : > { %3425 = dma.hbm_to_vmem [thread:$0]  (!%p4195_p6), %s5280_s8, 16, %s472_s13, [#allocation15]  }
  0xf9   : > { %s4066_s17 = smov [#allocation19]   ;;  %s4067_s20 = smov [#allocation22]  }
  0xfa   : > { %s493_s1 = sshll.u32 %s4066_s17, 4  ;;  %s515_s24 = sshll.u32 %s4067_s20, 4  ;;  %s494_s1 = int_to_ptr.vmem [resolvable:$true] %s493_s1  ;;  %s516_s24 = int_to_ptr.vmem [resolvable:$true] %s515_s24 }
  0xfb   : > { %s3811_s25 = scalar_lea.hbm %s5282_s10, 16 }
  0xfc   : > { %p3812_p13 = scmp.ne.s32.totalorder %s5282_s10, %s3811_s25  ;;  %p3818_p3 = scmp.lt.u32.totalorder %s3811_s25, %s5282_s10 }
  0xfe   : > { %p3814_p0 = pnand %p3812_p13, %p4211_p8 }
 0x100   : > { %p3815_p1 = pneg %p3814_p0 }
 0x102   : > { %p3820_p2 = pnand %p3818_p3, %p3815_p1 }
 0x104   : > { %3823 = shalt.err (!%p3820_p2)
}
 0x105   : > { %s3824_s13 = scalar_lea.vmem %s494_s1, 16  ;;  %s3831_s26 = scalar_lea.vmem %s494_s1, 32 }
 0x106   : > { %p3825_p5 = scmp.ne.s32.totalorder %s494_s1, %s3824_s13  ;;  %p3832_p4 = scmp.lt.s32.totalorder %s494_s1, %s494_s1 }
 0x107   : > { %p3833_p10 = scmp.lt.s32.totalorder %s3831_s26, %s3824_s13 }
 0x108   : > { %p3827_p7 = pnand %p3825_p5, %p4211_p8 }
 0x109   : > { %p3834_p11 = por %p3833_p10, %p3832_p4 }
 0x10a   : > { %p3828_p9 = pneg %p3827_p7 }
 0x10c   : > { %p3835_p12 = pnand %p3834_p11, %p3828_p9 }
 0x10e   : > { %3838 = shalt.err (!%p3835_p12)
}
 0x10f   : > { %3431 = dma.hbm_to_vmem [thread:$0]  (!%p4195_p6), %s5282_s10, 16, %s494_s1, [#allocation18]  }
 0x110   : > { %s3839_s22 = scalar_lea.hbm %s5284_s12, 16 }
 0x111   : > { %p3840_p13 = scmp.ne.s32.totalorder %s5284_s12, %s3839_s22  ;;  %p3846_p3 = scmp.lt.u32.totalorder %s3839_s22, %s5284_s12 }
 0x113   : > { %p3842_p0 = pnand %p3840_p13, %p4211_p8 }
 0x115   : > { %p3843_p1 = pneg %p3842_p0 }
 0x117   : > { %p3848_p2 = pnand %p3846_p3, %p3843_p1 }
 0x119   : > { %3851 = shalt.err (!%p3848_p2)
}
 0x11a   : > { %s3852_s27 = scalar_lea.vmem %s516_s24, 16  ;;  %s3859_s1 = scalar_lea.vmem %s516_s24, 32 }
 0x11b   : > { %p3853_p5 = scmp.ne.s32.totalorder %s516_s24, %s3852_s27  ;;  %p3860_p4 = scmp.lt.s32.totalorder %s516_s24, %s516_s24 }
 0x11c   : > { %p3861_p10 = scmp.lt.s32.totalorder %s3859_s1, %s3852_s27 }
 0x11d   : > { %p3855_p7 = pnand %p3853_p5, %p4211_p8 }
 0x11e   : > { %p3862_p11 = por %p3861_p10, %p3860_p4 }
 0x11f   : > { %p3856_p9 = pneg %p3855_p7 }
 0x121   : > { %p3863_p12 = pnand %p3862_p11, %p3856_p9 }
 0x123   : > { %3866 = shalt.err (!%p3863_p12)
}
 0x124   : > { %s5319_s21 = sld [smem:[#allocation36_spill]]  ;;  %s3142_s26 = sadd.s32 4294967294, %s4053_s16  }
 0x125   : > { %3437 = dma.hbm_to_vmem [thread:$0]  (!%p4195_p6), %s5284_s12, 16, %s516_s24, [#allocation21]  }
 0x126   : > { %s4439_s23 = sadd.s32 1, %s4053_s16   ;;  %s49_s14 = sadd.s32 1, %s4049_s15 }
 0x127   : > { %s46_s28 = ssub.s32 %s4053_s16, %s4439_s23  ;;  %p56_p8 = scmp.ne.s32.totalorder %s4049_s15, %s4045_s30 }
 0x128   : > { %p47_p13 = scmp.eq.s32.totalorder %s46_s28, 0  ;;  %p57_p0 = scmp.eq.s32.totalorder %s4053_s16, 0 }
 0x129   : > { %p62_p1 = scmp.ne.s32.totalorder %s4045_s30, %s4041_s29  ;;  %p349_p9 = scmp.eq.s32.totalorder %s3142_s26, 1 }
 0x12a   : > { %p343_p3 = scmp.eq.s32.totalorder %s5319_s21, 1  ;;  %p58_p2 = por %p57_p0, %p56_p8 }
 0x12b   : > { %s4451_s17 = scalar_select %p47_p13, %s4049_s15, %s49_s14  }
 0x12c   : > { %p5320_p5 = scmp.eq.s32.totalorder %s5319_s21, 0  ;;  %p4459_p6 = por %p343_p3, %p56_p8 }
 0x12d   : > { %p3463_p4 = scmp.lt.s32.totalorder %s4053_s16, 2  ;;  %s4465_s22 = sand.u32 1, %s4049_s15  }
 0x12e   : > { %p4455_p7 = por %p5320_p5, %p62_p1  ;;  %p4467_p10 = por %p349_p9, %p62_p1 }
 0x12f   : > { %s5322_s20 = scalar_select %p4459_p6, 1, 0 }
 0x130   : > { %s5321_s24 = scalar_select %p4455_p7, 1, 0 }
 0x131   : > { %s5323_s18 = scalar_select %p4467_p10, 1, 0 }
 0x132   : > { %s3156_s25 = sshll.u32 %s4465_s22, 3  ;;  %s3157_s19 = sshll.u32 %s4053_s16, 7 }
 0x133   : > { %s5324_s1 = sld [smem:[#allocation38_spill]]  ;;  %s530_s13 = scalar_lea.vmem [#allocation2], %s3156_s25 }
 0x134   : > { %s537_s21 = sshll.u32 %s530_s13, 4  ;;  %p4478_p11 = pnand %p3463_p4, %p58_p2  ;;  %s4482_s21 = int_to_ptr.vmem [resolvable:$true] %s537_s21 }
 0x135   : > { %s527_s28 = scalar_lea.sflag [#allocation3], %s4465_s22 }
 0x136   : > { %p3869_p8 = pneg %p4478_p11 }
 0x139   : > { %s4476_s2 = scalar_lea.hbm %s5324_s1, %s3157_s19  ;;  %s3872_s0 = scalar_lea.hbm %s5324_s1, 256 }
 0x13a   : > { %s3867_s3 = scalar_lea.hbm %s4476_s2, 128  ;;  %p3873_p1 = scmp.lt.u32.totalorder %s4476_s2, %s5324_s1 }
 0x13b   : > { %p3868_p12 = scmp.ne.s32.totalorder %s4476_s2, %s3867_s3  ;;  %p3874_p3 = scmp.lt.u32.totalorder %s3872_s0, %s3867_s3 }
 0x13c   : > { %p3876_p5 = scmp.lt.u32.totalorder %s3867_s3, %s4476_s2 }
 0x13d   : > { %p3870_p13 = pnand %p3869_p8, %p3868_p12  ;;  %p3875_p2 = por %p3874_p3, %p3873_p1 }
 0x13f   : > { %p3871_p0 = pneg %p3870_p13  ;;  %p3877_p9 = por %p3876_p5, %p3875_p2 }
 0x141   : > { %p3878_p4 = pnand %p3877_p9, %p3871_p0 }
 0x143   : > { %3881 = shalt.err (!%p3878_p4)
}
 0x144   : > { %s3882_s14 = scalar_lea.vmem %s4482_s21, 128  ;;  %s4068_s25 = smov [#allocation2]  }
 0x145   : > { %p3883_p12 = scmp.ne.s32.totalorder %s4482_s21, %s3882_s14  ;;  %s3887_s19 = sshll.u32 %s4068_s25, 4  ;;  %s3888_s19 = int_to_ptr.vmem [resolvable:$false] %s3887_s19 }
 0x146   : > { %s3889_s27 = scalar_lea.vmem %s3888_s19, 256  ;;  %p3890_p6 = scmp.lt.s32.totalorder %s4482_s21, %s3888_s19 }
 0x147   : > { %p3885_p13 = pnand %p3883_p12, %p3869_p8  ;;  %p3891_p1 = scmp.lt.s32.totalorder %s3889_s27, %s3882_s14 }
 0x149   : > { %p3886_p10 = pneg %p3885_p13  ;;  %p3892_p3 = por %p3891_p1, %p3890_p6 }
 0x14b   : > { %p3893_p2 = pnand %p3892_p3, %p3886_p10 }
 0x14d   : > { %3896 = shalt.err (!%p3893_p2)
}
 0x14e   : > { %3441 = dma.hbm_to_vmem [thread:$0]  (!%p4478_p11), %s4476_s2, 128, %s4482_s21, %s527_s28  }
 0x14f   : > { %s3158_s3 = sshll.u32 %s4053_s16, 4  ;;  %s5326_s25 = sld [smem:[#allocation39_spill]] }
 0x150   : > { %s547_s14 = scalar_lea.vmem [#allocation5], %s4465_s22  ;;  %s5327_s27 = sand.u32 1, %s4053_s16  }
 0x151   : > { %s554_s19 = sshll.u32 %s547_s14, 4  ;;  %s545_s4 = scalar_lea.sflag [#allocation6], %s5327_s27  ;;  %s555_s19 = int_to_ptr.vmem [resolvable:$true] %s554_s19 }
 0x155   : > { %s4515_s1 = scalar_lea.hbm %s5326_s25, %s3158_s3  ;;  %s3902_s28 = scalar_lea.hbm %s5326_s25, 32 }
 0x156   : > { %s3897_s5 = scalar_lea.hbm %s4515_s1, 16  ;;  %p3903_p5 = scmp.lt.u32.totalorder %s4515_s1, %s5326_s25 }
 0x157   : > { %p3898_p6 = scmp.ne.s32.totalorder %s4515_s1, %s3897_s5  ;;  %p3904_p9 = scmp.lt.u32.totalorder %s3902_s28, %s3897_s5 }
 0x158   : > { %p3906_p12 = scmp.lt.u32.totalorder %s3897_s5, %s4515_s1 }
 0x159   : > { %p3900_p10 = pnand %p3898_p6, %p3869_p8  ;;  %p3905_p4 = por %p3904_p9, %p3903_p5 }
 0x15b   : > { %p3901_p0 = pneg %p3900_p10  ;;  %p3907_p13 = por %p3906_p12, %p3905_p4 }
 0x15d   : > { %p3908_p1 = pnand %p3907_p13, %p3901_p0 }
 0x15f   : > { %3911 = shalt.err (!%p3908_p1)
}
 0x160   : > { %s3912_s22 = scalar_lea.vmem %s555_s19, 16  ;;  %s4069_s13 = smov [#allocation5]  }
 0x161   : > { %p3913_p3 = scmp.ne.s32.totalorder %s555_s19, %s3912_s22  ;;  %s3917_s14 = sshll.u32 %s4069_s13, 4  ;;  %s3918_s14 = int_to_ptr.vmem [resolvable:$false] %s3917_s14 }
 0x162   : > { %s3919_s27 = scalar_lea.vmem %s3918_s14, 32  ;;  %p3920_p10 = scmp.lt.s32.totalorder %s555_s19, %s3918_s14 }
 0x163   : > { %p3915_p2 = pnand %p3913_p3, %p3869_p8  ;;  %p3921_p7 = scmp.lt.s32.totalorder %s3919_s27, %s3912_s22 }
 0x165   : > { %p3916_p6 = pneg %p3915_p2  ;;  %p3922_p5 = por %p3921_p7, %p3920_p10 }
 0x167   : > { %p3923_p9 = pnand %p3922_p5, %p3916_p6 }
 0x169   : > { %3926 = shalt.err (!%p3923_p9)
}
 0x16a   : > { %3444 = dma.hbm_to_vmem [thread:$0]  (!%p4478_p11), %s4515_s1, 16, %s555_s19, %s545_s4  }
 0x16b   : > { %s5328_s5 = sld [smem:[#allocation37_spill]] }
 0x171   : > { %p5329_p0 = scmp.ne.s32.totalorder %s5328_s5, 0 }
 0x172   : > { %s4542_s2 = sand.u32 (!%p5329_p0), 1, %s4045_s30   ;;  %p5330_p7 = scmp.ne.s32.totalorder (!%p5329_p0), %s5321_s24, 0 }
 0x173   : > { %563 = sbr.rel (%p5329_p0) target bundleno = 2730 (0xaaa), region = 72  ;;  %s5301_s21 = sshll.u32 (!%p5329_p0), %s4542_s2, 3 }
 0x174   : > { %s566_s28 = scalar_lea.sflag (!%p5329_p0), [#allocation3], %s4542_s2  ;;  %s4548_s3 = scalar_lea.vmem (!%p5329_p0), [#allocation2], %s5301_s21 }
 0x17a   : > { %4000 = dma.done.wait (%p5330_p7), %s566_s28, 128  }
 0x17b   : > { %4002 = vsyncadd (%p5330_p7), %s566_s28, 4294967168  ;;  %s5331_s4 = sld [smem:[#allocation36_spill]]  ;;  %s577_s19 = scalar_lea.vmem [#allocation5], %s4542_s2 }
 0x181   : > { %s574_s1 = sand.u32 1, %s5331_s4  }
 0x182   : > { %s575_s26 = scalar_lea.sflag [#allocation6], %s574_s1 }
 0x183   : > { %4004 = dma.done.wait (%p5330_p7), %s575_s26, 16  }
 0x184   : > { %4006 = vsyncadd (%p5330_p7), %s575_s26, 4294967280  ;;  %p5332_p11 = scmp.eq.s32.totalorder %s5331_s4, 0 }
 0x186   : > { %4008 = dma.done.wait (%p5332_p11), [#allocation6], 1024   ;;  %p5333_p8 = pmov %p5332_p11 }
 0x188   : > { %4010 = vsyncadd (%p5333_p8), [#allocation6], 4294966272  ;;  %p5334_p4 = pmov %p5333_p8 }
 0x18a   : > { %4012 = dma.done.wait (%p5334_p4), [#allocation9], 1024   ;;  %p5335_p12 = pmov %p5334_p4 }
 0x18b   : > { %p5336_p13 = pmov %p5334_p4 }
 0x18c   : > { %4014 = vsyncadd (%p5335_p12), [#allocation9], 4294966272 }
 0x18d   : > { %4016 = dma.done.wait (%p5336_p13), [#allocation12], 1024   ;;  %p5337_p1 = pmov %p5334_p4 }
 0x18f   : > { %4018 = vsyncadd (%p5337_p1), [#allocation12], 4294966272  ;;  %p5338_p3 = pmov %p5337_p1 }
 0x190   : > { %p5339_p2 = pmov %p5337_p1 }
 0x191   : > { %4020 = dma.done.wait (%p5338_p3), [#allocation15], 32  }
 0x192   : > { %4022 = vsyncadd (%p5339_p2), [#allocation15], 4294967264  ;;  %p5340_p6 = pmov %p5337_p1 }
 0x193   : > { %p5341_p10 = pmov %p5337_p1 }
 0x194   : > { %4024 = dma.done.wait (%p5340_p6), [#allocation18], 32  }
 0x195   : > { %4026 = vsyncadd (%p5341_p10), [#allocation18], 4294967264  ;;  %p5342_p5 = pmov %p5337_p1 }
 0x196   : > { %p5343_p9 = pmov %p5337_p1 }
 0x197   : > { %4028 = dma.done.wait (%p5342_p5), [#allocation21], 32  }
 0x198   : > { %4030 = vsyncadd (%p5343_p9), [#allocation21], 4294967264  ;;  %v5300_v0 = vmov 0.0|0.0   ;;  %vm4071_vm0 = vmmov 0   ;;  %v4072_v1 = vmov 0.0   ;;  %v685_v2 = vld [vmem:[#allocation8] sm:$0xff]  ;;  %v937_v17 = vlaneseq }
 0x199   : > { %3328 = vmatprep.subr.bf16.mxu0 %v5300_v0  ;;  %3334 = vmatprep.subr.bf16.mxu1 %v5300_v0  ;;  %v686_v3 = vld [vmem:[#allocation8 + $0x8] sm:$0xff]  ;;  %v770_v4 = vld [vmem:[#allocation10] sm:$0xff]  ;;  %v687_v7 = vld [vmem:[#allocation8 + $0x10] sm:$0xff]  ;;  %vm696_vm1 = vcmask 261120   ;;  %v4073_v15 = vmov 1966171168  }
 0x19a   : > { %3252 = vmatprep.mubr.msk.f32.mxu0 %vm4071_vm0, %v4072_v1  ;;  %3263 = vmatprep.mubr.msk.f32.mxu1 %vm4071_vm0, %v4072_v1  ;;  %v3329_v5 = vpack.c.bf16 %v686_v3, %v685_v2  ;;  %v771_v6 = vld [vmem:[#allocation10 + $0x8] sm:$0xff]  ;;  %v688_v8 = vld [vmem:[#allocation8 + $0x18] sm:$0xff]  ;;  %v772_v10 = vld [vmem:[#allocation10 + $0x10] sm:$0xff]  ;;  %v935_v16 = vunpack.c.l.s4 %v4073_v15  ;;  %v4606_v19 = vshrl.u32 %v937_v17, 7  ;;  %vm1030_vm2 = vcmask 64512   ;;  %s4074_s24 = smov 120  }
 0x19b   : > { %v3335_v9 = vpack.c.bf16 %v771_v6, %v770_v4  ;;  %v773_v11 = vld [vmem:[#allocation10 + $0x18] sm:$0xff]  ;;  %v3332_v12 = vpack.c.bf16 %v688_v8, %v687_v7  ;;  %v3174_v20 = vld [vmem:[#allocation14] ss:$0 sm:$0xff]  ;;  %v3176_v21 = vld [vmem:[#allocation16] ss:$0 sm:$0xff]  ;;  %s4075_s0 = smov 112  }
 0x19c   : > { %3330 = vmatpush3.bf16.msra.mxu0 %v3329_v5  ;;  %v3338_v13 = vpack.c.bf16 %v773_v11, %v772_v10  ;;  %v4593_v14 = vld [vmem:[%s4548_s3] sm:$0xff]  ;;  %v936_v18 = vunpack.c.0.s8 %v935_v16  ;;  %v4615_v30 = vsub.s32 0, %v4606_v19  ;;  %v4622_v35 = vld [vmem:[#allocation7] sm:$0xff]  ;;  %vm1097_vm3 = vcmask 1041409   ;;  %s3173_s22 = sshll.u32 %s4542_s2, 5  ;;  %s4076_s14 = smov 104  }
 0x19d   : > { %3336 = vmatpush3.bf16.msra.mxu1 %v3335_v9  ;;  %3331 = vmatprep.subr.bf16.mxu0 %v5300_v0  ;;  %v4629_v40 = vld [vmem:[#allocation7 + $0x10] sm:$0xff]  ;;  %v4631_v41 = vld [vmem:[#allocation7 + $0x8] sm:$0xff]  ;;  %v4643_v47 = vld [vmem:[#allocation7 + $0x18] sm:$0xff]  ;;  %vm1099_vm4 = vcmask 1042434   ;;  %vm1101_vm5 = vcmask 1043459   ;;  %vm1103_vm6 = vcmask 1044484  }
 0x19e   : > { %3337 = vmatprep.subr.bf16.mxu1 %v5300_v0  ;;  %v939_v22 = vsub.s32 %v936_v18, %v4606_v19  ;;  %v4656_v55 = vld [vmem:[#allocation7 + $0x20] sm:$0xff]  ;;  %v4665_v61 = vld [vmem:[#allocation7 + $0x28] sm:$0xff]  ;;  %v4673_v3 = vld [vmem:[#allocation7 + $0x30] sm:$0xff]  ;;  %vm1105_vm7 = vcmask 1045509   ;;  %vm1107_vm8 = vcmask 1046534   ;;  %vm1109_vm9 = vcmask 1047559  }
 0x19f   : > { %v4680_v6 = vld [vmem:[#allocation7 + $0x38] sm:$0xff]  ;;  %v852_v15 = vld [vmem:[#allocation11 + $0x8] sm:$0xff]  ;;  %v853_v18 = vld [vmem:[#allocation11 + $0x10] sm:$0xff]  ;;  %s4729_s13 = scalar_lea.vmem [#allocation24], %s3173_s22  ;;  %s4077_s27 = smov 8   ;;  %vm2761_vm10 = vcmask 130048  }
 0x1a0   : > { %3333 = vmatpush3.bf16.msra.mxu0 %v3332_v12  ;;  %s4078_s5 = smov 16   ;;  %s4079_s28 = smov 24   ;;  %vm2763_vm11 = vcmask 195584  }
 0x1a1   : > { %3339 = vmatpush3.bf16.msra.mxu1 %v3338_v13  ;;  %3340 = vmatprep.subr.bf16.mxu0 %v5300_v0  ;;  %v851_v13 = vld [vmem:[#allocation11] sm:$0xff]  ;;  %s2913_s1 = sshll.u32 %s4729_s13, 4  ;;  %s3207_s26 = sshll.u32 %s5331_s4, 9  ;;  %s5188_s1 = int_to_ptr.vmem [resolvable:$true] %s2913_s1 }
 0x1a2   : > { %3277 = vmatprep.subr.mxu1 %v4072_v1  ;;  %v3341_v16 = vpack.c.bf16 %v852_v15, %v851_v13  ;;  %s2887_s22 = scalar_lea.sflag [#allocation25], %s4542_s2  ;;  %p5347_p7 = scmp.ne.s32.totalorder %s5322_s20, 0 }
 0x1a3   : > { %3253 = vmatmul.mubr.msk.f32.vlgmr.msra.gmra.mrb[0].mxu0 %vm696_vm1, %v4593_v14 }
 0x1a4   : > { %3264 = vmatmul.mubr.msk.f32.vlgmr.msra.gmra.mrb[0].mxu1 %vm696_vm1, %v4593_v14  ;;  %3274 = vmatprep.mubr.msk.f32.mxu0 %vm4071_vm0, %v4072_v1 }
 0x1a5   : > { %3279 = vmatprep.mubr.msk.f32.mxu1 %vm4071_vm0, %v4072_v1  ;;  %3342 = vmatpush3.bf16.msra.mxu0 %v3341_v16 }
 0x1a6   : > { %3343 = vmatprep.subr.bf16.mxu0 %v5300_v0 }
 0x276   : > { %v766_v23 = vpop.f32.mrb[0].mxu0 }
 0x277   : > { %v4609_v24 = vadd.f32 %v3174_v20, %v766_v23  ;;  %v847_v25 = vpop.f32.mrb[0].mxu1  ;;  %v3254_v26 = vpop.f32.mrb[1].mxu0  ;;  %v854_v20 = vld [vmem:[#allocation11 + $0x18] sm:$0xff] }
 0x278   : > { %v4611_v27 = vadd.f32 %v3176_v21, %v847_v25  ;;  %v3265_v28 = vpop.f32.mrb[1].mxu1  ;;  %v3344_v21 = vpack.c.bf16 %v854_v20, %v853_v18 }
 0x279   : > { %v940_v29 = vrot.slane %v4609_v24, %v939_v22  ;;  %v933_v31 = vcombine.high %v4609_v24, %v4609_v24 }
 0x27a   : > { %3278 = vmatpush3.xpose.msk.msra.mxu1 %vm1030_vm2, %v4611_v27  ;;  %3345 = vmatpush3.bf16.msra.mxu0 %v3344_v21 }
 0x27b   : > { %v956_v32 = vrot.slane %v940_v29, %v939_v22  ;;  %v948_v33 = vcombine.high %v940_v29, %v940_v29  ;;  %v947_v34 = vrot.slane %v933_v31, %v939_v22  ;;  %3282 = vmatprep.subr.mxu1 %v4072_v1  ;;  %3297 = vmatprep.subr.mxu0 %v4072_v1 }
 0x27d   : > { %3280 = vmatmul.mubr.msk.f32.vlgmr.msra.gmra.mrb[2].mxu1 %vm1030_vm2, %v4609_v24  ;;  %v4627_v36 = vrot.slane %v956_v32, %v4615_v30  ;;  %v978_v37 = vcombine.high %v956_v32, %v956_v32  ;;  %v970_v38 = vrot.slane %v948_v33, %v939_v22  ;;  %v963_v39 = vrot.slane %v947_v34, %v939_v22 }
 0x27e   : > { %v949_v42 = vcombine.high %v947_v34, %v947_v34  ;;  %3284 = vmatprep.mubr.msk.f32.mxu1 %vm4071_vm0, %v4072_v1  ;;  %3275 = vmatmul.mubr.msk.f32.vlgmr.msra.gmra.mrb[2].mxu0 %vm696_vm1, %v4593_v14  ;;  %v1064_v14 = vand.u32 127, %v937_v17 }
 0x27f   : > { %v1022_v43 = vmul.f32 %v4627_v36, %v4622_v35  ;;  %v4638_v44 = vrot.slane %v978_v37, %v4615_v30  ;;  %v4641_v45 = vrot.slane %v970_v38, %v4615_v30  ;;  %v980_v46 = vcombine.high %v970_v38, %v970_v38  ;;  %3299 = vmatprep.mubr.msk.f32.mxu0 %vm4071_vm0, %v4072_v1 }
 0x280   : > { %v4646_v48 = vrot.slane %v963_v39, %v4615_v30  ;;  %v977_v49 = vrot.slane %v949_v42, %v939_v22  ;;  %v979_v50 = vcombine.high %v963_v39, %v963_v39  ;;  %v4706_v32 = vsub.s32 %v1064_v14, %v4606_v19 }
 0x281   : > { %v1031_v51 = vsel %vm1030_vm2, %v1022_v43, 0.0  ;;  %v1024_v52 = vmul.f32 %v4638_v44, %v4629_v40  ;;  %v1023_v53 = vmul.f32 %v4641_v45, %v4631_v41  ;;  %v4654_v54 = vrot.slane %v980_v46, %v4615_v30 }
 0x282   : > { %1032 = vadd.xlane.f32.xlu0 %v1031_v51  ;;  %v4659_v56 = vrot.slane %v977_v49, %v4615_v30  ;;  %v981_v60 = vcombine.high %v977_v49, %v977_v49  ;;  %v1026_v63 = vmul.f32 %v4646_v48, %v4656_v55  ;;  %v4671_v2 = vrot.slane %v979_v50, %v4615_v30 }
 0x283   : > { %v1037_v57 = vsel %vm1030_vm2, %v1024_v52, 0.0  ;;  %v1034_v58 = vsel %vm1030_vm2, %v1023_v53, 0.0  ;;  %v1025_v59 = vmul.f32 %v4654_v54, %v4643_v47 }
 0x284   : > { %1038 = vadd.xlane.f32.xlu1 %v1037_v57  ;;  %v1027_v4 = vmul.f32 %v4659_v56, %v4665_v61  ;;  %v4678_v5 = vrot.slane %v981_v60, %v4615_v30  ;;  %v1043_v7 = vsel %vm1030_vm2, %v1026_v63, 0.0  ;;  %v1028_v8 = vmul.f32 %v4671_v2, %v4673_v3 }
 0x285   : > { %v1040_v62 = vsel %vm1030_vm2, %v1025_v59, 0.0 }
 0x286   : > { %1035 = vadd.xlane.f32.xlu0 %v1034_v58  ;;  %v1046_v9 = vsel %vm1030_vm2, %v1027_v4, 0.0  ;;  %v1029_v10 = vmul.f32 %v4678_v5, %v4680_v6  ;;  %v1049_v11 = vsel %vm1030_vm2, %v1028_v8, 0.0 }
 0x288   : > { %1041 = vadd.xlane.f32.xlu1 %v1040_v62  ;;  %v1052_v12 = vsel %vm1030_vm2, %v1029_v10, 0.0 }
 0x28a   : > { %1044 = vadd.xlane.f32.xlu0 %v1043_v7  ;;  %v4726_v7 = vld [vmem:[%s577_s19] ss:$0 sm:$0xff] }
 0x28c   : > { %1047 = vadd.xlane.f32.xlu1 %v1046_v9 }
 0x28e   : > { %1050 = vadd.xlane.f32.xlu0 %v1049_v11 }
 0x290   : > { %1053 = vadd.xlane.f32.xlu1 %v1052_v12 }
 0x2a1   : > { %1512 = vrot.lane.b32.xlu1 %v4609_v24, %s4074_s24 }
 0x2a5   : > { %1956 = vrot.lane.b32.xlu1 %v4611_v27, %s4075_s0 }
 0x30f   : > { %v1033_v31 = vpop.xlane.xlu0 %1032 }
 0x310   : > { %v1068_v34 = vrot.slane %v1033_v31, %v4706_v32 }
 0x311   : > { %v1039_v22 = vpop.xlane.xlu1 %1038 }
 0x312   : > { %v1076_v38 = vrot.slane %v1039_v22, %v4706_v32 }
 0x313   : > { %v1036_v33 = vpop.xlane.xlu0 %1035 }
 0x314   : > { %v1072_v37 = vrot.slane %v1036_v33, %v4706_v32  ;;  %v3178_v33 = vld [vmem:[#allocation17] ss:$0 sm:$0xff] }
 0x315   : > { %v1042_v23 = vpop.xlane.xlu1 %1041 }
 0x316   : > { %v1098_v39 = vsel %vm1097_vm3, %v1072_v37, %v1068_v34  ;;  %v1080_v42 = vrot.slane %v1042_v23, %v4706_v32 }
 0x317   : > { %v1045_v43 = vpop.xlane.xlu0 %1044  ;;  %v1100_v46 = vsel %vm1099_vm4, %v1076_v38, %v1098_v39 }
 0x318   : > { %v1084_v17 = vrot.slane %v1045_v43, %v4706_v32  ;;  %v1102_v49 = vsel %vm1101_vm5, %v1080_v42, %v1100_v46 }
 0x319   : > { %v1048_v25 = vpop.xlane.xlu1 %1047 }
 0x31a   : > { %v1088_v50 = vrot.slane %v1048_v25, %v4706_v32  ;;  %v1104_v52 = vsel %vm1103_vm6, %v1084_v17, %v1102_v49 }
 0x31b   : > { %v1051_v51 = vpop.xlane.xlu0 %1050 }
 0x31c   : > { %v1092_v53 = vrot.slane %v1051_v51, %v4706_v32  ;;  %v1106_v57 = vsel %vm1105_vm7, %v1088_v50, %v1104_v52 }
 0x31d   : > { %v1054_v26 = vpop.xlane.xlu1 %1053 }
 0x31e   : > { %v1096_v58 = vrot.slane %v1054_v26, %v4706_v32  ;;  %v1108_v59 = vsel %vm1107_vm8, %v1092_v53, %v1106_v57 }
 0x320   : > { %v1110_v60 = vsel %vm1109_vm9, %v1096_v58, %v1108_v59 }
 0x321   : > { %v4700_v28 = vpop.permute.xlu1 %1512 }
 0x325   : > { %v1957_v29 = vpop.permute.xlu1 %1956 }
 0x326   : > { %3298 = vmatpush3.xpose.msk.msra.mxu0 %vm1030_vm2, %v1957_v29 }
 0x327   : > { %3307 = vmatprep.subr.mxu0 %v4072_v1 }
 0x350   : > { %v1183_v62 = vpop.f32.mrb[2].mxu1 }
 0x351   : > { %v1184_v63 = vadd.f32 %v1183_v62, %v1110_v60  ;;  %v3281_v4 = vpop.f32.mrb[3].mxu1  ;;  %v928_v34 = vpop.f32.mrb[2].mxu0 }
 0x352   : > { %v4784_v37 = vadd.f32 %v3178_v33, %v928_v34  ;;  %v3276_v38 = vpop.f32.mrb[3].mxu0 }
 0x353   : > { %v1187_v8 = vmul.f32 0.35355338, %v1184_v63 }
 0x354   : > { %3283 = vmatpush3.msra.mxu1 %v4784_v37 }
 0x355   : > { %v1194_v9 = vadd.f32 %v4726_v7, %v1187_v8  ;;  %3287 = vmatprep.subr.mxu1 %v4072_v1 }
 0x357   : > { %1195 = vst.msk [vmem:[%s4729_s13] sm:$0xff] %vm1030_vm2, %v1194_v9  ;;  %v1196_v10 = vsel %vm1030_vm2, %v1194_v9, -inf }
 0x358   : > { %1197 = vmax.xlane.f32.xlu0 %v1196_v10 }
 0x36e   : > { %1514 = vrot.lane.b32.xlu0 %v4611_v27, %s4074_s24 }
 0x372   : > { %2397 = vrot.lane.b32.xlu0 %v4611_v27, %s4076_s14 }
 0x376   : > { %1424 = vrot.lane.b32.xlu0 %v4622_v35, %s4077_s27 }
 0x37a   : > { %1428 = vrot.lane.b32.xlu0 %v4629_v40, %s4077_s27 }
 0x37e   : > { %1432 = vrot.lane.b32.xlu0 %v4656_v55, %s4077_s27 }
 0x382   : > { %1866 = vrot.lane.b32.xlu0 %v4622_v35, %s4078_s5 }
 0x386   : > { %1436 = vrot.lane.b32.xlu0 %v4673_v3, %s4077_s27 }
 0x38a   : > { %1438 = vrot.lane.b32.xlu0 %v4680_v6, %s4077_s27 }
 0x38e   : > { %1874 = vrot.lane.b32.xlu0 %v4656_v55, %s4078_s5 }
 0x392   : > { %2307 = vrot.lane.b32.xlu0 %v4622_v35, %s4079_s28 }
 0x396   : > { %1878 = vrot.lane.b32.xlu0 %v4673_v3, %s4078_s5 }
 0x39a   : > { %1880 = vrot.lane.b32.xlu0 %v4680_v6, %s4078_s5 }
 0x39e   : > { %2315 = vrot.lane.b32.xlu0 %v4656_v55, %s4079_s28 }
 0x3a2   : > { %2319 = vrot.lane.b32.xlu0 %v4673_v3, %s4079_s28 }
 0x3e5   : > { %v1198_v27 = vpop.xlane.xlu0 %1197 }
 0x3e6   : > { %v1199_v11 = vsub.f32 %v1194_v9, %v1198_v27 }
 0x3e8   : > { %v1200_v12 = vmul.f32 1.442695, %v1199_v11 }
 0x3e9   : > { %v4762_v13 = vpop.permute.xlu0 %1514 }
 0x3ea   : > { %3532 = vpow2.f32 %v1200_v12 }
 0x3ed   : > { %v4764_v15 = vpop.permute.xlu0 %2397 }
 0x3f1   : > { %v1425_v35 = vpop.permute.xlu0 %1424 }
 0x3f2   : > { %v1448_v16 = vmul.f32 %v1425_v35, %v4627_v36 }
 0x3f4   : > { %v4767_v18 = vpop.eup %3532  ;;  %1464 = vrot.lane.b32.xlu0 %v1448_v16, %s4074_s24 }
 0x3f5   : > { %v1429_v20 = vpop.permute.xlu0 %1428  ;;  %v1202_v55 = vsel %vm1030_vm2, %v4767_v18, 0.0 }
 0x3f6   : > { %v1450_v3 = vmul.f32 %v1429_v20, %v4638_v44  ;;  %1203 = vadd.xlane.f32.xlu1 %v1202_v55 }
 0x3f8   : > { %1468 = vrot.lane.b32.xlu0 %v1450_v3, %s4074_s24 }
 0x3f9   : > { %v1433_v21 = vpop.permute.xlu0 %1432 }
 0x3fa   : > { %v1452_v22 = vmul.f32 %v1433_v21, %v4646_v48 }
 0x3fc   : > { %1472 = vrot.lane.b32.xlu0 %v1452_v22, %s4074_s24 }
 0x3fd   : > { %v1867_v23 = vpop.permute.xlu0 %1866 }
 0x3fe   : > { %v1890_v25 = vmul.f32 %v1867_v23, %v4627_v36 }
 0x400   : > { %1906 = vrot.lane.b32.xlu0 %v1890_v25, %s4075_s0 }
 0x401   : > { %v1437_v26 = vpop.permute.xlu0 %1436 }
 0x402   : > { %v1454_v29 = vmul.f32 %v1437_v26, %v4671_v2 }
 0x404   : > { %1476 = vrot.lane.b32.xlu0 %v1454_v29, %s4074_s24 }
 0x405   : > { %v1439_v31 = vpop.permute.xlu0 %1438 }
 0x406   : > { %v1455_v14 = vmul.f32 %v1439_v31, %v4678_v5 }
 0x407   : > { %1954 = vrot.lane.b32.xlu1 %v4609_v24, %s4075_s0 }
 0x408   : > { %1478 = vrot.lane.b32.xlu0 %v1455_v14, %s4074_s24 }
 0x409   : > { %v1875_v39 = vpop.permute.xlu0 %1874 }
 0x40a   : > { %v1894_v42 = vmul.f32 %v1875_v39, %v4646_v48 }
 0x40b   : > { %2395 = vrot.lane.b32.xlu1 %v4609_v24, %s4076_s14 }
 0x40c   : > { %1914 = vrot.lane.b32.xlu0 %v1894_v42, %s4075_s0 }
 0x40d   : > { %v2308_v43 = vpop.permute.xlu0 %2307 }
 0x40e   : > { %v2331_v46 = vmul.f32 %v2308_v43, %v4627_v36 }
 0x40f   : > { %1426 = vrot.lane.b32.xlu1 %v4631_v41, %s4077_s27 }
 0x410   : > { %2347 = vrot.lane.b32.xlu0 %v2331_v46, %s4076_s14 }
 0x411   : > { %v1879_v17 = vpop.permute.xlu0 %1878 }
 0x412   : > { %v1896_v49 = vmul.f32 %v1879_v17, %v4671_v2 }
 0x413   : > { %1430 = vrot.lane.b32.xlu1 %v4643_v47, %s4077_s27 }
 0x414   : > { %1918 = vrot.lane.b32.xlu0 %v1896_v49, %s4075_s0 }
 0x415   : > { %v1881_v24 = vpop.permute.xlu0 %1880 }
 0x416   : > { %v1897_v50 = vmul.f32 %v1881_v24, %v4678_v5 }
 0x417   : > { %1434 = vrot.lane.b32.xlu1 %v4665_v61, %s4077_s27 }
 0x418   : > { %1920 = vrot.lane.b32.xlu0 %v1897_v50, %s4075_s0 }
 0x419   : > { %v2316_v36 = vpop.permute.xlu0 %2315 }
 0x41a   : > { %v2335_v51 = vmul.f32 %v2316_v36, %v4646_v48 }
 0x41b   : > { %1868 = vrot.lane.b32.xlu1 %v4631_v41, %s4078_s5 }
 0x41c   : > { %2355 = vrot.lane.b32.xlu0 %v2335_v51, %s4076_s14 }
 0x41d   : > { %v2320_v52 = vpop.permute.xlu0 %2319 }
 0x41e   : > { %v2337_v53 = vmul.f32 %v2320_v52, %v4671_v2 }
 0x41f   : > { %1870 = vrot.lane.b32.xlu1 %v4629_v40, %s4078_s5 }
 0x420   : > { %2359 = vrot.lane.b32.xlu0 %v2337_v53, %s4076_s14 }
 0x423   : > { %1872 = vrot.lane.b32.xlu1 %v4643_v47, %s4078_s5 }
 0x427   : > { %1876 = vrot.lane.b32.xlu1 %v4665_v61, %s4078_s5 }
 0x42b   : > { %2309 = vrot.lane.b32.xlu1 %v4631_v41, %s4079_s28 }
 0x42f   : > { %2311 = vrot.lane.b32.xlu1 %v4629_v40, %s4079_s28 }
 0x433   : > { %2313 = vrot.lane.b32.xlu1 %v4643_v47, %s4079_s28 }
 0x437   : > { %2317 = vrot.lane.b32.xlu1 %v4665_v61, %s4079_s28 }
 0x43b   : > { %2321 = vrot.lane.b32.xlu1 %v4680_v6, %s4079_s28 }
 0x466   : > { %v1465_v48 = vpop.permute.xlu0 %1464 }
 0x467   : > { %v1488_v2 = vsel %vm1030_vm2, %v1465_v48, 0.0 }
 0x468   : > { %1489 = vadd.xlane.f32.xlu0 %v1488_v2 }
 0x46a   : > { %v1469_v57 = vpop.permute.xlu0 %1468 }
 0x46b   : > { %v1494_v58 = vsel %vm1030_vm2, %v1469_v57, 0.0 }
 0x46c   : > { %1495 = vadd.xlane.f32.xlu0 %v1494_v58 }
 0x46e   : > { %v1473_v25 = vpop.permute.xlu0 %1472 }
 0x46f   : > { %v1500_v34 = vsel %vm1030_vm2, %v1473_v25, 0.0 }
 0x472   : > { %v1907_v26 = vpop.permute.xlu0 %1906 }
 0x473   : > { %v1930_v42 = vsel %vm1030_vm2, %v1907_v26, 0.0 }
 0x483   : > { %v1204_v41 = vpop.xlane.xlu1 %1203 }
 0x484   : > { %3534 = vrcp.f32 %v1204_v41 }
 0x487   : > { %v1955_v40 = vpop.permute.xlu1 %1954 }
 0x488   : > { %3300 = vmatmul.mubr.msk.f32.vlgmr.msra.gmra.mrb[4].mxu0 %vm1030_vm2, %v1955_v40 }
 0x489   : > { %3308 = vmatpush3.xpose.msk.msra.mxu0 %vm1030_vm2, %v4764_v15  ;;  %3309 = vmatprep.mubr.msk.f32.mxu0 %vm4071_vm0, %v4072_v1 }
 0x48a   : > { %3346 = vmatprep.subr.bf16.mxu0 %v5300_v0 }
 0x48b   : > { %v2396_v47 = vpop.permute.xlu1 %2395 }
 0x48c   : > { %3310 = vmatmul.mubr.msk.f32.vlgmr.msra.gmra.mrb[6].mxu0 %vm1030_vm2, %v2396_v47 }
 0x48d   : > { %3325 = vmatprep.mubr.msk.f32.mxu0 %vm4071_vm0, %v4072_v1 }
 0x48e   : > { %v3535_v61 = vpop.eup %3534 }
 0x48f   : > { %v4838_v6 = vmul.f32 %v3535_v61, %v4767_v18  ;;  %v1427_v59 = vpop.permute.xlu1 %1426 }
 0x490   : > { %v1449_v60 = vmul.f32 %v1427_v59, %v4641_v45 }
 0x491   : > { %3285 = vmatmul.mubr.msk.f32.vlgmr.msra.gmra.mrb[4].mxu1 %vm1030_vm2, %v4838_v6 }
 0x492   : > { %3288 = vmatpush3.xpose.msk.msra.mxu1 %vm1030_vm2, %v4762_v13  ;;  %1466 = vrot.lane.b32.xlu1 %v1449_v60, %s4074_s24 }
 0x493   : > { %v1431_v62 = vpop.permute.xlu1 %1430  ;;  %3289 = vmatprep.mubr.msk.f32.mxu1 %vm4071_vm0, %v4072_v1  ;;  %3292 = vmatprep.subr.mxu1 %v4072_v1 }
 0x494   : > { %v1451_v63 = vmul.f32 %v1431_v62, %v4654_v54 }
 0x495   : > { %3290 = vmatmul.mubr.msk.f32.vlgmr.msra.gmra.mrb[6].mxu1 %vm1030_vm2, %v4700_v28 }
 0x496   : > { %1470 = vrot.lane.b32.xlu1 %v1451_v63, %s4074_s24  ;;  %3294 = vmatprep.mubr.msk.f32.mxu1 %vm4071_vm0, %v4072_v1 }
 0x497   : > { %v1435_v4 = vpop.permute.xlu1 %1434 }
 0x498   : > { %v1453_v8 = vmul.f32 %v1435_v4, %v4659_v56 }
 0x49a   : > { %1474 = vrot.lane.b32.xlu1 %v1453_v8, %s4074_s24 }
 0x49b   : > { %v1869_v9 = vpop.permute.xlu1 %1868 }
 0x49c   : > { %v1891_v10 = vmul.f32 %v1869_v9, %v4641_v45 }
 0x49e   : > { %1908 = vrot.lane.b32.xlu1 %v1891_v10, %s4075_s0 }
 0x49f   : > { %v1871_v27 = vpop.permute.xlu1 %1870 }
 0x4a0   : > { %v1892_v11 = vmul.f32 %v1871_v27, %v4638_v44 }
 0x4a2   : > { %1910 = vrot.lane.b32.xlu1 %v1892_v11, %s4075_s0 }
 0x4a3   : > { %v1873_v28 = vpop.permute.xlu1 %1872 }
 0x4a4   : > { %v1893_v12 = vmul.f32 %v1873_v28, %v4654_v54 }
 0x4a6   : > { %1912 = vrot.lane.b32.xlu1 %v1893_v12, %s4075_s0 }
 0x4a7   : > { %v1877_v13 = vpop.permute.xlu1 %1876 }
 0x4a8   : > { %v1895_v15 = vmul.f32 %v1877_v13, %v4659_v56 }
 0x4aa   : > { %1916 = vrot.lane.b32.xlu1 %v1895_v15, %s4075_s0 }
 0x4ab   : > { %v2310_v35 = vpop.permute.xlu1 %2309 }
 0x4ac   : > { %v2332_v16 = vmul.f32 %v2310_v35, %v4641_v45 }
 0x4ae   : > { %2349 = vrot.lane.b32.xlu1 %v2332_v16, %s4076_s14 }
 0x4af   : > { %v2312_v18 = vpop.permute.xlu1 %2311 }
 0x4b0   : > { %v2333_v20 = vmul.f32 %v2312_v18, %v4638_v44  ;;  %v1477_v44 = vpop.permute.xlu0 %1476 }
 0x4b1   : > { %v1506_v17 = vsel %vm1030_vm2, %v1477_v44, 0.0 }
 0x4b2   : > { %2351 = vrot.lane.b32.xlu1 %v2333_v20, %s4076_s14 }
 0x4b3   : > { %v2314_v55 = vpop.permute.xlu1 %2313 }
 0x4b4   : > { %v2334_v3 = vmul.f32 %v2314_v55, %v4654_v54  ;;  %v1479_v33 = vpop.permute.xlu0 %1478 }
 0x4b5   : > { %v1509_v36 = vsel %vm1030_vm2, %v1479_v33, 0.0 }
 0x4b6   : > { %2353 = vrot.lane.b32.xlu1 %v2334_v3, %s4076_s14 }
 0x4b7   : > { %v2318_v21 = vpop.permute.xlu1 %2317 }
 0x4b8   : > { %v2336_v22 = vmul.f32 %v2318_v21, %v4659_v56 }
 0x4ba   : > { %2357 = vrot.lane.b32.xlu1 %v2336_v22, %s4076_s14 }
 0x4bb   : > { %v2322_v23 = vpop.permute.xlu1 %2321 }
 0x4bc   : > { %v2338_v45 = vmul.f32 %v2322_v23, %v4678_v5  ;;  %v1915_v5 = vpop.permute.xlu0 %1914 }
 0x4bd   : > { %v1942_v48 = vsel %vm1030_vm2, %v1915_v5, 0.0 }
 0x4be   : > { %2361 = vrot.lane.b32.xlu1 %v2338_v45, %s4076_s14 }
 0x4c0   : > { %v2348_v24 = vpop.permute.xlu0 %2347 }
 0x4c1   : > { %v2371_v58 = vsel %vm1030_vm2, %v2348_v24, 0.0 }
 0x4c4   : > { %v1919_v52 = vpop.permute.xlu0 %1918 }
 0x4c5   : > { %v1948_v61 = vsel %vm1030_vm2, %v1919_v52, 0.0 }
 0x4c8   : > { %v1921_v40 = vpop.permute.xlu0 %1920 }
 0x4c9   : > { %v1951_v63 = vsel %vm1030_vm2, %v1921_v40, 0.0 }
 0x4cc   : > { %v2356_v60 = vpop.permute.xlu0 %2355 }
 0x4cd   : > { %v2383_v9 = vsel %vm1030_vm2, %v2356_v60, 0.0 }
 0x4d0   : > { %v2360_v27 = vpop.permute.xlu0 %2359 }
 0x4d1   : > { %v2389_v28 = vsel %vm1030_vm2, %v2360_v27, 0.0 }
 0x4f5   : > { %v1490_v21 = vpop.xlane.xlu0 %1489 }
 0x4f9   : > { %v1496_v22 = vpop.xlane.xlu0 %1495 }
 0x504   : > { %v1467_v29 = vpop.permute.xlu1 %1466 }
 0x505   : > { %v1491_v31 = vsel %vm1030_vm2, %v1467_v29, 0.0  ;;  %v1527_v29 = vrot.slane %v1490_v21, %v4706_v32 }
 0x506   : > { %1492 = vadd.xlane.f32.xlu1 %v1491_v31 }
 0x508   : > { %v1471_v54 = vpop.permute.xlu1 %1470 }
 0x509   : > { %v1497_v14 = vsel %vm1030_vm2, %v1471_v54, 0.0 }
 0x50a   : > { %1498 = vadd.xlane.f32.xlu0 %v1497_v14 }
 0x50c   : > { %v1475_v56 = vpop.permute.xlu1 %1474 }
 0x50d   : > { %v1503_v38 = vsel %vm1030_vm2, %v1475_v56, 0.0  ;;  %v1535_v56 = vrot.slane %v1496_v22, %v4706_v32 }
 0x50e   : > { %1501 = vadd.xlane.f32.xlu0 %v1500_v34  ;;  %1504 = vadd.xlane.f32.xlu1 %v1503_v38 }
 0x510   : > { %v1909_v39 = vpop.permute.xlu1 %1908 }
 0x511   : > { %v1933_v43 = vsel %vm1030_vm2, %v1909_v39, 0.0 }
 0x512   : > { %1931 = vadd.xlane.f32.xlu0 %v1930_v42  ;;  %1934 = vadd.xlane.f32.xlu1 %v1933_v43 }
 0x514   : > { %v1911_v46 = vpop.permute.xlu1 %1910 }
 0x515   : > { %v1936_v49 = vsel %vm1030_vm2, %v1911_v46, 0.0 }
 0x516   : > { %1507 = vadd.xlane.f32.xlu0 %v1506_v17  ;;  %1937 = vadd.xlane.f32.xlu1 %v1936_v49 }
 0x518   : > { %v1913_v50 = vpop.permute.xlu1 %1912 }
 0x519   : > { %v1939_v51 = vsel %vm1030_vm2, %v1913_v50, 0.0 }
 0x51a   : > { %1510 = vadd.xlane.f32.xlu0 %v1509_v36  ;;  %1940 = vadd.xlane.f32.xlu1 %v1939_v51 }
 0x51c   : > { %v1917_v53 = vpop.permute.xlu1 %1916 }
 0x51d   : > { %v1945_v2 = vsel %vm1030_vm2, %v1917_v53, 0.0 }
 0x51e   : > { %1943 = vadd.xlane.f32.xlu0 %v1942_v48  ;;  %1946 = vadd.xlane.f32.xlu1 %v1945_v2 }
 0x520   : > { %v2350_v57 = vpop.permute.xlu1 %2349 }
 0x521   : > { %v2374_v41 = vsel %vm1030_vm2, %v2350_v57, 0.0 }
 0x522   : > { %2372 = vadd.xlane.f32.xlu0 %v2371_v58  ;;  %2375 = vadd.xlane.f32.xlu1 %v2374_v41 }
 0x524   : > { %v2352_v47 = vpop.permute.xlu1 %2351 }
 0x525   : > { %v2377_v59 = vsel %vm1030_vm2, %v2352_v47, 0.0 }
 0x526   : > { %1949 = vadd.xlane.f32.xlu0 %v1948_v61  ;;  %2378 = vadd.xlane.f32.xlu1 %v2377_v59 }
 0x528   : > { %v2354_v62 = vpop.permute.xlu1 %2353 }
 0x529   : > { %v2380_v4 = vsel %vm1030_vm2, %v2354_v62, 0.0 }
 0x52a   : > { %1952 = vadd.xlane.f32.xlu0 %v1951_v63  ;;  %2381 = vadd.xlane.f32.xlu1 %v2380_v4 }
 0x52c   : > { %v2358_v8 = vpop.permute.xlu1 %2357 }
 0x52d   : > { %v2386_v10 = vsel %vm1030_vm2, %v2358_v8, 0.0 }
 0x52e   : > { %2384 = vadd.xlane.f32.xlu0 %v2383_v9  ;;  %2387 = vadd.xlane.f32.xlu1 %v2386_v10 }
 0x530   : > { %v2362_v11 = vpop.permute.xlu1 %2361 }
 0x531   : > { %v2392_v12 = vsel %vm1030_vm2, %v2362_v11, 0.0 }
 0x532   : > { %2390 = vadd.xlane.f32.xlu0 %v2389_v28  ;;  %2393 = vadd.xlane.f32.xlu1 %v2392_v12 }
 0x55b   : > { %v4897_v13 = vpop.f32.mrb[4].mxu0 }
 0x55c   : > { %v3301_v15 = vpop.f32.mrb[5].mxu0 }
 0x55f   : > { %v4899_v35 = vpop.f32.mrb[6].mxu0 }
 0x560   : > { %v3311_v16 = vpop.f32.mrb[7].mxu0 }
 0x564   : > { %v4901_v18 = vpop.f32.mrb[4].mxu1 }
 0x565   : > { %v3286_v20 = vpop.f32.mrb[5].mxu1 }
 0x568   : > { %v1634_v55 = vpop.f32.mrb[6].mxu1 }
 0x569   : > { %v3291_v3 = vpop.f32.mrb[7].mxu1 }
 0x593   : > { %v1493_v23 = vpop.xlane.xlu1 %1492 }
 0x594   : > { %v1531_v44 = vrot.slane %v1493_v23, %v4706_v32 }
 0x596   : > { %v1556_v14 = vsel %vm1097_vm3, %v1531_v44, %v1527_v29 }
 0x597   : > { %v1499_v45 = vpop.xlane.xlu0 %1498  ;;  %v1557_v38 = vsel %vm1099_vm4, %v1535_v56, %v1556_v14 }
 0x598   : > { %v1539_v33 = vrot.slane %v1499_v45, %v4706_v32 }
 0x59a   : > { %v1558_v42 = vsel %vm1101_vm5, %v1539_v33, %v1557_v38 }
 0x59b   : > { %v1502_v25 = vpop.xlane.xlu0 %1501  ;;  %v1505_v26 = vpop.xlane.xlu1 %1504 }
 0x59c   : > { %v1543_v34 = vrot.slane %v1502_v25, %v4706_v32  ;;  %v1547_v43 = vrot.slane %v1505_v26, %v4706_v32 }
 0x59e   : > { %v1559_v46 = vsel %vm1103_vm6, %v1543_v34, %v1558_v42 }
 0x59f   : > { %v1932_v31 = vpop.xlane.xlu0 %1931  ;;  %v1935_v54 = vpop.xlane.xlu1 %1934  ;;  %v1560_v50 = vsel %vm1105_vm7, %v1547_v43, %v1559_v46 }
 0x5a0   : > { %v1969_v58 = vrot.slane %v1932_v31, %v4706_v32  ;;  %v1973_v41 = vrot.slane %v1935_v54, %v4706_v32 }
 0x5a2   : > { %v1998_v4 = vsel %vm1097_vm3, %v1973_v41, %v1969_v58 }
 0x5a3   : > { %v1508_v5 = vpop.xlane.xlu0 %1507  ;;  %v1938_v39 = vpop.xlane.xlu1 %1937 }
 0x5a4   : > { %v1551_v17 = vrot.slane %v1508_v5, %v4706_v32  ;;  %v1977_v40 = vrot.slane %v1938_v39, %v4706_v32 }
 0x5a6   : > { %v1561_v51 = vsel %vm1107_vm8, %v1551_v17, %v1560_v50  ;;  %v1999_v8 = vsel %vm1099_vm4, %v1977_v40, %v1998_v4 }
 0x5a7   : > { %v1511_v49 = vpop.xlane.xlu0 %1510  ;;  %v1941_v24 = vpop.xlane.xlu1 %1940 }
 0x5a8   : > { %v1555_v36 = vrot.slane %v1511_v49, %v4706_v32  ;;  %v1981_v60 = vrot.slane %v1941_v24, %v4706_v32 }
 0x5aa   : > { %v1562_v52 = vsel %vm1109_vm9, %v1555_v36, %v1561_v51  ;;  %v2000_v27 = vsel %vm1101_vm5, %v1981_v60, %v1999_v8 }
 0x5ab   : > { %v1635_v53 = vadd.f32 %v1634_v55, %v1562_v52  ;;  %v1944_v48 = vpop.xlane.xlu0 %1943  ;;  %v1947_v2 = vpop.xlane.xlu1 %1946 }
 0x5ac   : > { %v1985_v62 = vrot.slane %v1944_v48, %v4706_v32  ;;  %v1989_v11 = vrot.slane %v1947_v2, %v4706_v32 }
 0x5ad   : > { %v1638_v57 = vmul.f32 0.35355338, %v1635_v53 }
 0x5ae   : > { %v2001_v28 = vsel %vm1103_vm6, %v1985_v62, %v2000_v27 }
 0x5af   : > { %v2373_v47 = vpop.xlane.xlu0 %2372  ;;  %v2376_v61 = vpop.xlane.xlu1 %2375  ;;  %v4922_v59 = vadd.f32 %v4726_v7, %v1638_v57  ;;  %v2002_v3 = vsel %vm1105_vm7, %v1989_v11, %v2001_v28 }
 0x5b0   : > { %v2410_v15 = vrot.slane %v2373_v47, %v4706_v32  ;;  %v2414_v16 = vrot.slane %v2376_v61, %v4706_v32 }
 0x5b1   : > { %v1642_v63 = vsel %vm1030_vm2, %v4922_v59, -inf  ;;  %3186 = vst.msk [vmem:[%s4729_s13 + $0x8] sm:$0xff] %vm1030_vm2, %v4922_v59 }
 0x5b2   : > { %1643 = vmax.xlane.f32.xlu0 %v1642_v63  ;;  %v2439_v26 = vsel %vm1097_vm3, %v2414_v16, %v2410_v15 }
 0x5b3   : > { %v1950_v9 = vpop.xlane.xlu0 %1949  ;;  %v2379_v10 = vpop.xlane.xlu1 %2378 }
 0x5b4   : > { %v1993_v12 = vrot.slane %v1950_v9, %v4706_v32  ;;  %v2418_v21 = vrot.slane %v2379_v10, %v4706_v32 }
 0x5b6   : > { %v2003_v23 = vsel %vm1107_vm8, %v1993_v12, %v2002_v3  ;;  %v2440_v54 = vsel %vm1099_vm4, %v2418_v21, %v2439_v26  ;;  %v4989_v3 = vsub.s32 3, %v4606_v19  ;;  %v1244_v26 = vsub.s32 5, %v4606_v19 }
 0x5b7   : > { %v1953_v20 = vpop.xlane.xlu0 %1952  ;;  %v2382_v55 = vpop.xlane.xlu1 %2381 }
 0x5b8   : > { %v1997_v22 = vrot.slane %v1953_v20, %v4706_v32  ;;  %v2422_v45 = vrot.slane %v2382_v55, %v4706_v32 }
 0x5ba   : > { %v2004_v25 = vsel %vm1109_vm9, %v1997_v22, %v2003_v23  ;;  %v2441_v56 = vsel %vm1101_vm5, %v2422_v45, %v2440_v54  ;;  %v1237_v23 = vsub.s32 4, %v4606_v19 }
 0x5bb   : > { %v2077_v44 = vadd.f32 %v4897_v13, %v2004_v25  ;;  %v2385_v29 = vpop.xlane.xlu0 %2384  ;;  %v2388_v31 = vpop.xlane.xlu1 %2387 }
 0x5bc   : > { %v2426_v14 = vrot.slane %v2385_v29, %v4706_v32  ;;  %v2430_v34 = vrot.slane %v2388_v31, %v4706_v32  ;;  %v1251_v31 = vsub.s32 6, %v4606_v19 }
 0x5bd   : > { %v2080_v33 = vmul.f32 0.35355338, %v2077_v44 }
 0x5be   : > { %v2442_v38 = vsel %vm1103_vm6, %v2426_v14, %v2441_v56 }
 0x5bf   : > { %v2391_v5 = vpop.xlane.xlu0 %2390  ;;  %v2394_v39 = vpop.xlane.xlu1 %2393  ;;  %v2081_v42 = vadd.f32 %v4726_v7, %v2080_v33  ;;  %v2443_v46 = vsel %vm1105_vm7, %v2430_v34, %v2442_v38  ;;  %v1258_v33 = vsub.s32 7, %v4606_v19 }
 0x5c0   : > { %v2434_v13 = vrot.slane %v2391_v5, %v4706_v32  ;;  %v2438_v43 = vrot.slane %v2394_v39, %v4706_v32 }
 0x5c1   : > { %v2084_v17 = vsel %vm1030_vm2, %v2081_v42, -inf  ;;  %3190 = vst.msk [vmem:[%s4729_s13 + $0x10] sm:$0xff] %vm1030_vm2, %v2081_v42 }
 0x5c2   : > { %v2444_v49 = vsel %vm1107_vm8, %v2434_v13, %v2443_v46  ;;  %2085 = vmax.xlane.f32.xlu1 %v2084_v17 }
 0x5c3   : > { %v2445_v24 = vsel %vm1109_vm9, %v2438_v43, %v2444_v49 }
 0x5c4   : > { %v2518_v50 = vadd.f32 %v4899_v35, %v2445_v24 }
 0x5c6   : > { %v2521_v36 = vmul.f32 0.35355338, %v2518_v50 }
 0x5c8   : > { %v2522_v51 = vadd.f32 %v4726_v7, %v2521_v36 }
 0x5ca   : > { %v2525_v52 = vsel %vm1030_vm2, %v2522_v51, -inf  ;;  %3194 = vst.msk [vmem:[%s4729_s13 + $0x18] sm:$0xff] %vm1030_vm2, %v2522_v51 }
 0x5cb   : > { %2526 = vmax.xlane.f32.xlu0 %v2525_v52  ;;  %v1210_v52 = vrot.slane %v4838_v6, %v4615_v30 }
 0x63f   : > { %v1644_v2 = vpop.xlane.xlu0 %1643 }
 0x640   : > { %v1645_v61 = vsub.f32 %v4922_v59, %v1644_v2  ;;  %v4978_v59 = vsub.s32 1, %v4606_v19  ;;  %v1245_v2 = vrot.slane %v4838_v6, %v1244_v26 }
 0x642   : > { %v1646_v60 = vmul.f32 1.442695, %v1645_v61 }
 0x64f   : > { %v2086_v32 = vpop.xlane.xlu1 %2085 }
 0x650   : > { %v2087_v53 = vsub.f32 %v2081_v42, %v2086_v32 }
 0x652   : > { %v2088_v48 = vmul.f32 1.442695, %v2087_v53  ;;  %v1231_v53 = vrot.slane %v4838_v6, %v4989_v3 }
 0x654   : > { %3536 = vpow2.f32 %v2088_v48  ;;  %v1238_v48 = vrot.slane %v4838_v6, %v1237_v23 }
 0x658   : > { %v2527_v57 = vpop.xlane.xlu0 %2526 }
 0x659   : > { %v2528_v58 = vsub.f32 %v2522_v51, %v2527_v57  ;;  %v1259_v57 = vrot.slane %v4838_v6, %v1258_v33 }
 0x65b   : > { %v2529_v41 = vmul.f32 1.442695, %v2528_v58 }
 0x65d   : > { %3538 = vpow2.f32 %v2529_v41 }
 0x65e   : > { %v3537_v40 = vpop.eup %3536  ;;  %3540 = vpow2.f32 %v1646_v60 }
 0x65f   : > { %v2090_v35 = vsel %vm1030_vm2, %v3537_v40, 0.0 }
 0x660   : > { %2091 = vadd.xlane.f32.xlu0 %v2090_v35 }
 0x667   : > { %v3539_v47 = vpop.eup %3538 }
 0x668   : > { %v2531_v7 = vsel %vm1030_vm2, %v3539_v47, 0.0  ;;  %v3541_v62 = vpop.eup %3540 }
 0x669   : > { %2532 = vadd.xlane.f32.xlu1 %v2531_v7  ;;  %v1648_v63 = vsel %vm1030_vm2, %v3541_v62, 0.0 }
 0x676   : > { %1774 = vrot.lane.b32.xlu0 %v4784_v37, %s4074_s24  ;;  %s5346_s24 = sld [smem:[#allocation45_spill]] }
 0x67a   : > { %2215 = vrot.lane.b32.xlu1 %v4784_v37, %s4075_s0 }
 0x67c   : > { %s5194_s0 = scalar_lea.hbm %s5346_s24, %s3207_s26 }
 0x69e   : > { %1649 = vadd.xlane.f32.xlu1 %v1648_v63  ;;  %v5026_v63 = vld [vmem:[#allocation7 + $0x8] sm:$0xff] }
 0x6af   : > { %2656 = vrot.lane.b32.xlu1 %v4784_v37, %s4076_s14  ;;  %v4983_v37 = vsub.s32 2, %v4606_v19  ;;  %s3927_s14 = scalar_lea.vmem %s5188_s1, 512 }
 0x6b0   : > { %p3928_p0 = scmp.ne.s32.totalorder %s5188_s1, %s3927_s14 }
 0x6b1   : > { %v1224_v32 = vrot.slane %v4838_v6, %v4983_v37 }
 0x6b2   : > { %p3929_p11 = pnand %p3928_p0, %p5347_p7 }
 0x6b4   : > { %p3930_p8 = pneg %p3929_p11 }
 0x6ed   : > { %v2092_v4 = vpop.xlane.xlu0 %2091 }
 0x6ee   : > { %3542 = vrcp.f32 %v2092_v4 }
 0x6f1   : > { %v1775_v8 = vpop.permute.xlu0 %1774 }
 0x6f2   : > { %3293 = vmatpush3.msra.mxu1 %v1775_v8 }
 0x6f3   : > { %3302 = vmatprep.subr.mxu1 %v4072_v1 }
 0x6f6   : > { %v2533_v9 = vpop.xlane.xlu1 %2532 }
 0x6f7   : > { %3544 = vrcp.f32 %v2533_v9  ;;  %v5029_v9 = vld [vmem:[#allocation7] sm:$0xff] }
 0x6f8   : > { %v3543_v10 = vpop.eup %3542 }
 0x6f9   : > { %v2094_v27 = vmul.f32 %v3543_v10, %v3537_v40 }
 0x6fa   : > { %v2216_v34 = vpop.permute.xlu1 %2215 }
 0x6fb   : > { %v2105_v11 = vrot.slane %v2094_v27, %v4978_v59  ;;  %v2098_v28 = vrot.slane %v2094_v27, %v4615_v30  ;;  %v2112_v12 = vrot.slane %v2094_v27, %v4983_v37  ;;  %v2119_v21 = vrot.slane %v2094_v27, %v4989_v3 }
 0x6fc   : > { %v2126_v25 = vrot.slane %v2094_v27, %v1237_v23  ;;  %v2133_v44 = vrot.slane %v2094_v27, %v1244_v26  ;;  %v2140_v14 = vrot.slane %v2094_v27, %v1251_v31  ;;  %v2147_v56 = vrot.slane %v2094_v27, %v1258_v33 }
 0x6fd   : > { %2107 = vbcast.lane.b32.xlu1 %v2105_v11, 256  ;;  %2100 = vbcast.lane.b32.xlu0 %v2098_v28, 256  ;;  %v5036_v11 = vld [vmem:[#allocation7 + $0x10] sm:$0xff] }
 0x701   : > { %v3545_v15 = vpop.eup %3544  ;;  %2114 = vbcast.lane.b32.xlu1 %v2112_v12, 256 }
 0x702   : > { %v2535_v16 = vmul.f32 %v3545_v15, %v3539_v47 }
 0x704   : > { %v2546_v20 = vrot.slane %v2535_v16, %v4978_v59  ;;  %v2539_v55 = vrot.slane %v2535_v16, %v4615_v30  ;;  %v2553_v22 = vrot.slane %v2535_v16, %v4983_v37  ;;  %v2560_v45 = vrot.slane %v2535_v16, %v4989_v3 }
 0x705   : > { %v2567_v29 = vrot.slane %v2535_v16, %v1237_v23  ;;  %v2574_v54 = vrot.slane %v2535_v16, %v1244_v26  ;;  %v2581_v36 = vrot.slane %v2535_v16, %v1251_v31  ;;  %v2588_v51 = vrot.slane %v2535_v16, %v1258_v33 }
 0x706   : > { %2548 = vbcast.lane.b32.xlu1 %v2546_v20, 256  ;;  %2541 = vbcast.lane.b32.xlu0 %v2539_v55, 256 }
 0x70a   : > { %2121 = vbcast.lane.b32.xlu1 %v2119_v21, 256  ;;  %2555 = vbcast.lane.b32.xlu0 %v2553_v22, 256 }
 0x70e   : > { %2562 = vbcast.lane.b32.xlu1 %v2560_v45, 256  ;;  %2128 = vbcast.lane.b32.xlu0 %v2126_v25, 256 }
 0x712   : > { %2135 = vbcast.lane.b32.xlu1 %v2133_v44, 256  ;;  %2569 = vbcast.lane.b32.xlu0 %v2567_v29, 256 }
 0x716   : > { %2576 = vbcast.lane.b32.xlu1 %v2574_v54, 256  ;;  %2142 = vbcast.lane.b32.xlu0 %v2140_v14, 256 }
 0x71a   : > { %2149 = vbcast.lane.b32.xlu0 %v2147_v56, 256 }
 0x72b   : > { %v1650_v38 = vpop.xlane.xlu1 %1649 }
 0x72c   : > { %3546 = vrcp.f32 %v1650_v38 }
 0x72f   : > { %v2657_v19 = vpop.permute.xlu1 %2656 }
 0x736   : > { %v3547_v5 = vpop.eup %3546 }
 0x737   : > { %v1652_v39 = vmul.f32 %v3547_v5, %v3541_v62 }
 0x739   : > { %3295 = vmatmul.mubr.msk.f32.vlgmr.msra.gmra.mrb[8].mxu1 %vm1030_vm2, %v1652_v39  ;;  %v1656_v42 = vrot.slane %v1652_v39, %v4615_v30  ;;  %v1663_v13 = vrot.slane %v1652_v39, %v4978_v59  ;;  %v1670_v43 = vrot.slane %v1652_v39, %v4983_v37  ;;  %v1677_v46 = vrot.slane %v1652_v39, %v4989_v3 }
 0x73a   : > { %3303 = vmatpush3.msra.mxu1 %v2216_v34  ;;  %3304 = vmatprep.mubr.msk.f32.mxu1 %vm4071_vm0, %v4072_v1  ;;  %v1691_v17 = vrot.slane %v1652_v39, %v1244_v26  ;;  %v1684_v49 = vrot.slane %v1652_v39, %v1237_v23  ;;  %v1705_v24 = vrot.slane %v1652_v39, %v1258_v33 }
 0x73b   : > { %1658 = vbcast.lane.b32.xlu1 %v1656_v42, 256  ;;  %1665 = vbcast.lane.b32.xlu0 %v1663_v13, 256  ;;  %v1698_v50 = vrot.slane %v1652_v39, %v1251_v31  ;;  %v1252_v30 = vrot.slane %v4838_v6, %v1251_v31  ;;  %v5050_v39 = vld [vmem:[#allocation7 + $0x18] sm:$0xff] }
 0x73c   : > { %3312 = vmatprep.subr.mxu1 %v4072_v1 }
 0x73d   : > { %3305 = vmatmul.mubr.msk.f32.vlgmr.msra.gmra.mrb[10].mxu1 %vm1030_vm2, %v2094_v27 }
 0x73e   : > { %3313 = vmatpush3.msra.mxu1 %v2657_v19  ;;  %3314 = vmatprep.mubr.msk.f32.mxu1 %vm4071_vm0, %v4072_v1  ;;  %v1217_v1 = vrot.slane %v4838_v6, %v4978_v59 }
 0x73f   : > { %1672 = vbcast.lane.b32.xlu1 %v1670_v43, 256  ;;  %1679 = vbcast.lane.b32.xlu0 %v1677_v46, 256 }
 0x741   : > { %3315 = vmatmul.mubr.msk.f32.vlgmr.msra.gmra.mrb[12].mxu1 %vm1030_vm2, %v2535_v16 }
 0x743   : > { %1693 = vbcast.lane.b32.xlu1 %v1691_v17, 256  ;;  %1686 = vbcast.lane.b32.xlu0 %v1684_v49, 256 }
 0x747   : > { %1707 = vbcast.lane.b32.xlu1 %v1705_v24, 256  ;;  %1700 = vbcast.lane.b32.xlu0 %v1698_v50, 256 }
 0x74b   : > { %2583 = vbcast.lane.b32.xlu1 %v2581_v36, 256  ;;  %2590 = vbcast.lane.b32.xlu0 %v2588_v51, 256 }
 0x74f   : > { %1212 = vbcast.lane.b32.xlu1 %v1210_v52, 256  ;;  %1219 = vbcast.lane.b32.xlu0 %v1217_v1, 256 }
 0x753   : > { %1226 = vbcast.lane.b32.xlu1 %v1224_v32, 256  ;;  %1233 = vbcast.lane.b32.xlu0 %v1231_v53, 256 }
 0x757   : > { %1240 = vbcast.lane.b32.xlu1 %v1238_v48, 256  ;;  %1247 = vbcast.lane.b32.xlu0 %v1245_v2, 256 }
 0x75b   : > { %1254 = vbcast.lane.b32.xlu1 %v1252_v30, 256  ;;  %1261 = vbcast.lane.b32.xlu0 %v1259_v57, 256 }
 0x76f   : > { %v2108_v58 = vpop.permute.xlu1 %2107  ;;  %v2101_v41 = vpop.permute.xlu0 %2100 }
 0x770   : > { %v2152_v4 = vmul.f32 %v5026_v63, %v2108_v58  ;;  %v2151_v6 = vmul.f32 %v5029_v9, %v2101_v41 }
 0x772   : > { %v2166_v10 = vsel %vm1030_vm2, %v2152_v4, 0.0  ;;  %v2159_v59 = vsel %vm1030_vm2, %v2151_v6, 0.0 }
 0x773   : > { %v2115_v35 = vpop.permute.xlu1 %2114  ;;  %v2167_v12 = vrot.slane %v2166_v10, 4  ;;  %v2160_v15 = vrot.slane %v2159_v59, 4 }
 0x774   : > { %v2153_v28 = vmul.f32 %v5036_v11, %v2115_v35 }
 0x775   : > { %v2168_v3 = vadd.f32 %v2167_v12, %v2166_v10  ;;  %v2161_v22 = vadd.f32 %v2160_v15, %v2159_v59  ;;  %v5064_v10 = vld [vmem:[#allocation7 + $0x20] sm:$0xff] }
 0x776   : > { %v2173_v20 = vsel %vm1030_vm2, %v2153_v28, 0.0 }
 0x777   : > { %v2174_v45 = vrot.slane %v2173_v20, 4  ;;  %v2169_v44 = vrot.slane %v2168_v3, 2  ;;  %v2162_v31 = vrot.slane %v2161_v22, 2 }
 0x778   : > { %v2542_v40 = vpop.permute.xlu0 %2541  ;;  %v2549_v7 = vpop.permute.xlu1 %2548 }
 0x779   : > { %v2593_v16 = vmul.f32 %v5026_v63, %v2549_v7  ;;  %v2592_v21 = vmul.f32 %v5029_v9, %v2542_v40  ;;  %v2175_v33 = vadd.f32 %v2174_v45, %v2173_v20  ;;  %v2170_v34 = vadd.f32 %v2169_v44, %v2168_v3 }
 0x77a   : > { %v2163_v38 = vadd.f32 %v2162_v31, %v2161_v22 }
 0x77b   : > { %v2607_v25 = vsel %vm1030_vm2, %v2593_v16, 0.0  ;;  %v2600_v29 = vsel %vm1030_vm2, %v2592_v21, 0.0  ;;  %v2176_v43 = vrot.slane %v2175_v33, 2  ;;  %v2171_v49 = vrot.slane %v2170_v34, 1 }
 0x77c   : > { %v2556_v47 = vpop.permute.xlu0 %2555  ;;  %v2122_v60 = vpop.permute.xlu1 %2121  ;;  %v2608_v54 = vrot.slane %v2607_v25, 4  ;;  %v2601_v56 = vrot.slane %v2600_v29, 4  ;;  %v2164_v24 = vrot.slane %v2163_v38, 1 }
 0x77d   : > { %v2154_v42 = vmul.f32 %v5050_v39, %v2122_v60  ;;  %v2594_v13 = vmul.f32 %v5036_v11, %v2556_v47  ;;  %v2177_v52 = vadd.f32 %v2176_v43, %v2175_v33  ;;  %v2172_v58 = vadd.f32 %v2171_v49, %v2170_v34 }
 0x77e   : > { %v2609_v5 = vadd.f32 %v2608_v54, %v2607_v25  ;;  %v2602_v46 = vadd.f32 %v2601_v56, %v2600_v29  ;;  %v2165_v41 = vadd.f32 %v2164_v24, %v2163_v38  ;;  %v5080_v54 = vld [vmem:[#allocation7 + $0x28] sm:$0xff] }
 0x77f   : > { %v2180_v36 = vsel %vm1030_vm2, %v2154_v42, 0.0  ;;  %v2614_v51 = vsel %vm1030_vm2, %v2594_v13, 0.0  ;;  %v2178_v47 = vrot.slane %v2177_v52, 1 }
 0x780   : > { %v5022_v61 = vpop.permute.xlu0 %2128  ;;  %v2563_v8 = vpop.permute.xlu1 %2562  ;;  %v2610_v50 = vrot.slane %v2609_v5, 2  ;;  %v2603_v53 = vrot.slane %v2602_v46, 2  ;;  %v2181_v30 = vrot.slane %v2180_v36, 4  ;;  %v2615_v57 = vrot.slane %v2614_v51, 4 }
 0x781   : > { %v2595_v7 = vmul.f32 %v5050_v39, %v2563_v8  ;;  %v2155_v59 = vmul.f32 %v5064_v10, %v5022_v61  ;;  %v5072_v45 = vsel %vm1097_vm3, %v2172_v58, %v2165_v41  ;;  %v5074_v25 = vadd.f32 %v2178_v47, %v2177_v52 }
 0x782   : > { %v2611_v40 = vadd.f32 %v2610_v50, %v2609_v5  ;;  %v5062_v6 = vadd.f32 %v2603_v53, %v2602_v46  ;;  %v2182_v15 = vadd.f32 %v2181_v30, %v2180_v36  ;;  %v2616_v16 = vadd.f32 %v2615_v57, %v2614_v51  ;;  %v5084_v5 = vld [vmem:[#allocation7 + $0x30] sm:$0xff] }
 0x783   : > { %v2187_v29 = vsel %vm1030_vm2, %v2155_v59, 0.0 }
 0x784   : > { %v5024_v62 = vpop.permute.xlu0 %2569  ;;  %v5039_v37 = vpop.permute.xlu1 %2135  ;;  %v2612_v8 = vrot.slane %v2611_v40, 1  ;;  %v2605_v44 = vrot.slane %v5062_v6, 1  ;;  %v2183_v56 = vrot.slane %v2182_v15, 2  ;;  %v2617_v34 = vrot.slane %v2616_v16, 2 }
 0x785   : > { %v2156_v49 = vmul.f32 %v5080_v54, %v5039_v37  ;;  %v2596_v36 = vmul.f32 %v5064_v10, %v5024_v62 }
 0x786   : > { %v5087_v13 = vadd.f32 %v2612_v8, %v2611_v40  ;;  %v5097_v53 = vadd.f32 %v2183_v56, %v2182_v15 }
 0x788   : > { %v5033_v27 = vpop.permute.xlu0 %2142  ;;  %v5046_v23 = vpop.permute.xlu1 %2576 }
 0x789   : > { %v2157_v30 = vmul.f32 %v5084_v5, %v5033_v27  ;;  %v2628_v27 = vsel %vm1030_vm2, %v2596_v36, 0.0 }
 0x78c   : > { %v5043_v55 = vpop.permute.xlu0 %2149 }
 0x7ad   : > { %v1666_v26 = vpop.permute.xlu0 %1665  ;;  %v1659_v14 = vpop.permute.xlu1 %1658 }
 0x7ae   : > { %v1709_v1 = vmul.f32 %v5029_v9, %v1659_v14  ;;  %v1710_v32 = vmul.f32 %v5026_v63, %v1666_v26  ;;  %v2621_v26 = vsel %vm1030_vm2, %v2595_v7, 0.0 }
 0x7b0   : > { %v1717_v60 = vsel %vm1030_vm2, %v1709_v1, 0.0  ;;  %v1724_v4 = vsel %vm1030_vm2, %v1710_v32, 0.0  ;;  %v5094_v1 = vld [vmem:[#allocation7 + $0x38] sm:$0xff] }
 0x7b1   : > { %v1680_v19 = vpop.permute.xlu0 %1679  ;;  %v1673_v17 = vpop.permute.xlu1 %1672  ;;  %v1718_v3 = vrot.slane %v1717_v60, 4  ;;  %v1725_v21 = vrot.slane %v1724_v4, 4  ;;  %v2158_v62 = vmul.f32 %v5094_v1, %v5043_v55 }
 0x7b2   : > { %v1711_v48 = vmul.f32 %v5036_v11, %v1673_v17  ;;  %v1712_v12 = vmul.f32 %v5050_v39, %v1680_v19  ;;  %v2622_v19 = vrot.slane %v2621_v26, 4  ;;  %v2188_v17 = vrot.slane %v2187_v29, 4 }
 0x7b3   : > { %v1719_v43 = vadd.f32 %v1718_v3, %v1717_v60  ;;  %v1726_v46 = vadd.f32 %v1725_v21, %v1724_v4 }
 0x7b4   : > { %v1731_v28 = vsel %vm1030_vm2, %v1711_v48, 0.0  ;;  %v1738_v31 = vsel %vm1030_vm2, %v1712_v12, 0.0  ;;  %v5099_v48 = vadd.f32 %v2617_v34, %v2616_v16  ;;  %v5108_v40 = vadd.f32 %v2622_v19, %v2621_v26 }
 0x7b5   : > { %v1687_v2 = vpop.permute.xlu0 %1686  ;;  %v1694_v35 = vpop.permute.xlu1 %1693  ;;  %v1732_v61 = vrot.slane %v1731_v28, 4  ;;  %v1739_v50 = vrot.slane %v1738_v31, 4  ;;  %v1720_v57 = vrot.slane %v1719_v43, 2  ;;  %v1727_v58 = vrot.slane %v1726_v46, 2 }
 0x7b6   : > { %v1713_v20 = vmul.f32 %v5064_v10, %v1687_v2  ;;  %v1714_v14 = vmul.f32 %v5080_v54, %v1694_v35  ;;  %v2597_v2 = vmul.f32 %v5080_v54, %v5046_v23  ;;  %v2189_v60 = vadd.f32 %v2188_v17, %v2187_v29 }
 0x7b7   : > { %v1733_v24 = vadd.f32 %v1732_v61, %v1731_v28  ;;  %v1740_v47 = vadd.f32 %v1739_v50, %v1738_v31  ;;  %v2194_v28 = vsel %vm1030_vm2, %v2156_v49, 0.0  ;;  %v2201_v16 = vsel %vm1030_vm2, %v2157_v30, 0.0 }
 0x7b8   : > { %v1745_v38 = vsel %vm1030_vm2, %v1713_v20, 0.0  ;;  %v1752_v51 = vsel %vm1030_vm2, %v1714_v14, 0.0  ;;  %v2635_v12 = vsel %vm1030_vm2, %v2597_v2, 0.0  ;;  %v2208_v20 = vsel %vm1030_vm2, %v2158_v62, 0.0 }
 0x7b9   : > { %v1701_v22 = vpop.permute.xlu0 %1700  ;;  %v1708_v33 = vpop.permute.xlu1 %1707  ;;  %v1746_v52 = vrot.slane %v1745_v38, 4  ;;  %v1734_v35 = vrot.slane %v1733_v24, 2  ;;  %v1753_v7 = vrot.slane %v1752_v51, 4  ;;  %v1721_v8 = vadd.f32 %v1720_v57, %v1719_v43 }
 0x7ba   : > { %v1715_v42 = vmul.f32 %v5084_v5, %v1701_v22  ;;  %v1716_v32 = vmul.f32 %v5094_v1, %v1708_v33  ;;  %v1728_v3 = vadd.f32 %v1727_v58, %v1726_v46  ;;  %v1741_v22 = vrot.slane %v1740_v47, 2 }
 0x7bb   : > { %v1747_v4 = vadd.f32 %v1746_v52, %v1745_v38  ;;  %v1735_v21 = vadd.f32 %v1734_v35, %v1733_v24  ;;  %v1754_v26 = vadd.f32 %v1753_v7, %v1752_v51  ;;  %v2195_v56 = vrot.slane %v2194_v28, 4 }
 0x7bc   : > { %v1759_v37 = vsel %vm1030_vm2, %v1715_v42, 0.0  ;;  %v1766_v23 = vsel %vm1030_vm2, %v1716_v32, 0.0  ;;  %v2629_v34 = vrot.slane %v2628_v27, 4  ;;  %v2636_v38 = vrot.slane %v2635_v12, 4 }
 0x7bd   : > { %v2584_v41 = vpop.permute.xlu1 %2583  ;;  %v1760_v59 = vrot.slane %v1759_v37, 4  ;;  %v2591_v15 = vpop.permute.xlu0 %2590  ;;  %v1767_v61 = vrot.slane %v1766_v23, 4  ;;  %v1748_v31 = vrot.slane %v1747_v4, 2  ;;  %v2202_v19 = vrot.slane %v2201_v16, 4 }
 0x7be   : > { %v2598_v55 = vmul.f32 %v5084_v5, %v2584_v41  ;;  %v2599_v33 = vmul.f32 %v5094_v1, %v2591_v15  ;;  %v2209_v17 = vrot.slane %v2208_v20, 4  ;;  %v1722_v49 = vrot.slane %v1721_v8, 1 }
 0x7bf   : > { %v1761_v14 = vadd.f32 %v1760_v59, %v1759_v37  ;;  %v1729_v43 = vrot.slane %v1728_v3, 1  ;;  %v1736_v46 = vrot.slane %v1735_v21, 1  ;;  %v1742_v24 = vadd.f32 %v1741_v22, %v1740_v47 }
 0x7c0   : > { %v2642_v42 = vsel %vm1030_vm2, %v2598_v55, 0.0  ;;  %v1755_v50 = vrot.slane %v1754_v26, 2  ;;  %v1768_v36 = vadd.f32 %v1767_v61, %v1766_v23  ;;  %v1749_v51 = vadd.f32 %v1748_v31, %v1747_v4 }
 0x7c1   : > { %v1762_v52 = vrot.slane %v1761_v14, 2  ;;  %v2643_v32 = vrot.slane %v2642_v42, 4  ;;  %v2649_v2 = vsel %vm1030_vm2, %v2599_v33, 0.0  ;;  %v2190_v37 = vrot.slane %v2189_v60, 2 }
 0x7c2   : > { %v2196_v30 = vadd.f32 %v2195_v56, %v2194_v28  ;;  %v2630_v62 = vadd.f32 %v2629_v34, %v2628_v27  ;;  %v2637_v57 = vadd.f32 %v2636_v38, %v2635_v12  ;;  %v2203_v58 = vadd.f32 %v2202_v19, %v2201_v16 }
 0x7c3   : > { %v2210_v41 = vadd.f32 %v2209_v17, %v2208_v20  ;;  %v1723_v35 = vadd.f32 %v1722_v49, %v1721_v8  ;;  %v1730_v7 = vadd.f32 %v1729_v43, %v1728_v3  ;;  %v1743_v59 = vrot.slane %v1742_v24, 1  ;;  %v2765_v17 = vld [vmem:[#allocation13] sm:$0xff]  ;;  %v2766_v49 = vld [vmem:[#allocation13 + $0x8] sm:$0xff] }
 0x7c4   : > { %v1756_v55 = vadd.f32 %v1755_v50, %v1754_v26  ;;  %v1769_v15 = vrot.slane %v1768_v36, 2  ;;  %v2650_v0 = vrot.slane %v2649_v2, 4  ;;  %v1737_v47 = vadd.f32 %v1736_v46, %v1735_v21 }
 0x7c5   : > { %v1750_v22 = vrot.slane %v1749_v51, 1  ;;  %v1763_v23 = vadd.f32 %v1762_v52, %v1761_v14  ;;  %v2644_v4 = vadd.f32 %v2643_v32, %v2642_v42  ;;  %v2624_v61 = vrot.slane %v5108_v40, 2 }
 0x7c6   : > { %v2191_v31 = vadd.f32 %v2190_v37, %v2189_v60  ;;  %v2197_v33 = vrot.slane %v2196_v30, 2  ;;  %v2631_v29 = vrot.slane %v2630_v62, 2  ;;  %v2638_v28 = vrot.slane %v2637_v57, 2 }
 0x7c7   : > { %v2204_v27 = vrot.slane %v2203_v58, 2  ;;  %v2211_v12 = vrot.slane %v2210_v41, 2  ;;  %v1785_v16 = vsel %vm1097_vm3, %v1730_v7, %v1723_v35  ;;  %v1744_v20 = vadd.f32 %v1743_v59, %v1742_v24  ;;  %v2768_v7 = vld [vmem:[#allocation13 + $0x18] sm:$0xff] }
 0x7c8   : > { %v1757_v8 = vrot.slane %v1756_v55, 1  ;;  %v1770_v3 = vadd.f32 %v1769_v15, %v1768_v36  ;;  %v2651_v26 = vadd.f32 %v2650_v0, %v2649_v2  ;;  %v1786_v56 = vsel %vm1099_vm4, %v1737_v47, %v1785_v16 }
 0x7c9   : > { %v1751_v21 = vadd.f32 %v1750_v22, %v1749_v51  ;;  %v1764_v34 = vrot.slane %v1763_v23, 1  ;;  %v2645_v14 = vrot.slane %v2644_v4, 2  ;;  %v2619_v38 = vrot.slane %v5099_v48, 1 }
 0x7ca   : > { %v2625_v60 = vadd.f32 %v2624_v61, %v5108_v40  ;;  %v2198_v42 = vadd.f32 %v2197_v33, %v2196_v30  ;;  %v2632_v19 = vadd.f32 %v2631_v29, %v2630_v62  ;;  %v2639_v43 = vadd.f32 %v2638_v28, %v2637_v57 }
 0x7cb   : > { %v2205_v46 = vadd.f32 %v2204_v27, %v2203_v58  ;;  %v2212_v50 = vadd.f32 %v2211_v12, %v2210_v41  ;;  %v3347_v24 = vpack.c.bf16 %v2766_v49, %v2765_v17  ;;  %v1758_v52 = vadd.f32 %v1757_v8, %v1756_v55  ;;  %v2767_v41 = vld [vmem:[#allocation13 + $0x10] sm:$0xff] }
 0x7cc   : > { %v1771_v36 = vrot.slane %v1770_v3, 1  ;;  %v2652_v0 = vrot.slane %v2651_v26, 2  ;;  %v1787_v32 = vsel %vm1101_vm5, %v1744_v20, %v1786_v56  ;;  %v2192_v51 = vrot.slane %v2191_v31, 1 }
 0x7cd   : > { %v1765_v2 = vadd.f32 %v1764_v34, %v1763_v23  ;;  %v2646_v37 = vadd.f32 %v2645_v14, %v2644_v4  ;;  %v1788_v35 = vsel %vm1103_vm6, %v1751_v21, %v1787_v32  ;;  %3348 = vmatpush3.bf16.msra.mxu0 %v3347_v24  ;;  %v2606_v40 = vadd.f32 %v2605_v44, %v5062_v6 }
 0x7ce   : > { %v5344_v29 = vrot.slane %v5097_v53, 1  ;;  %v2626_v62 = vrot.slane %v2625_v60, 1  ;;  %v2199_v57 = vrot.slane %v2198_v42, 1  ;;  %v5345_v58 = vmov 0.0|0.0  }
 0x7cf   : > { %3349 = vmatprep.subr.bf16.mxu0 %v5345_v58  ;;  %v2633_v59 = vrot.slane %v2632_v19, 1  ;;  %v2640_v55 = vrot.slane %v2639_v43, 1  ;;  %v2206_v15 = vrot.slane %v2205_v46, 1  ;;  %v3350_v47 = vpack.c.bf16 %v2768_v7, %v2767_v41 }
 0x7d0   : > { %v2186_v30 = vadd.f32 %v5344_v29, %v5097_v53  ;;  %v2213_v22 = vrot.slane %v2212_v50, 1  ;;  %v2653_v23 = vadd.f32 %v2652_v0, %v2651_v26  ;;  %v1772_v4 = vadd.f32 %v1771_v36, %v1770_v3 }
 0x7d1   : > { %v1789_v61 = vsel %vm1105_vm7, %v1758_v52, %v1788_v35  ;;  %v2620_v6 = vadd.f32 %v2619_v38, %v5099_v48  ;;  %v2193_v44 = vadd.f32 %v2192_v51, %v2191_v31  ;;  %v2647_v33 = vrot.slane %v2646_v37, 1  ;;  %3351 = vmatpush3.bf16.msra.mxu0 %v3350_v47 }
 0x7d2   : > { %v1790_v53 = vsel %vm1107_vm8, %v1765_v2, %v1789_v61  ;;  %v2227_v28 = vsel %vm1099_vm4, %v5074_v25, %v5072_v45  ;;  %v2627_v27 = vadd.f32 %v2626_v62, %v2625_v60  ;;  %v2200_v12 = vadd.f32 %v2199_v57, %v2198_v42  ;;  %v1213_v2 = vpop.permute.xlu1 %1212 }
 0x7d3   : > { %v2667_v16 = vsel %vm1097_vm3, %v5087_v13, %v2606_v40  ;;  %v2634_v20 = vadd.f32 %v2633_v59, %v2632_v19  ;;  %v2207_v8 = vadd.f32 %v2206_v15, %v2205_v46  ;;  %v2228_v3 = vsel %vm1101_vm5, %v2186_v30, %v2227_v28 }
 0x7d4   : > { %v2641_v26 = vadd.f32 %v2640_v55, %v2639_v43  ;;  %v2654_v48 = vrot.slane %v2653_v23, 1  ;;  %v1791_v31 = vsel %vm1109_vm9, %v1772_v4, %v1790_v53  ;;  %v2214_v21 = vadd.f32 %v2213_v22, %v2212_v50 }
 0x7d5   : > { %v2668_v34 = vsel %vm1099_vm4, %v2620_v6, %v2667_v16  ;;  %v2648_v14 = vadd.f32 %v2647_v33, %v2646_v37  ;;  %v2229_v25 = vsel %vm1103_vm6, %v2193_v44, %v2228_v3  ;;  %v1220_v37 = vpop.permute.xlu0 %1219  ;;  %v1263_v29 = vmul.f32 %v5029_v9, %v1213_v2 }
 0x7d6   : > { %v2230_v60 = vsel %vm1105_vm7, %v2200_v12, %v2229_v25  ;;  %v2669_v13 = vsel %vm1101_vm5, %v2627_v27, %v2668_v34  ;;  %v2655_v43 = vadd.f32 %v2654_v48, %v2653_v23  ;;  %v1227_v35 = vpop.permute.xlu1 %1226  ;;  %v1264_v30 = vmul.f32 %v5026_v63, %v1220_v37 }
 0x7d7   : > { %v2231_v42 = vsel %vm1107_vm8, %v2207_v8, %v2230_v60  ;;  %v2670_v19 = vsel %vm1103_vm6, %v2634_v20, %v2669_v13  ;;  %v1265_v57 = vmul.f32 %v5036_v11, %v1227_v35  ;;  %v1271_v58 = vsel %vm1030_vm2, %v1263_v29, 0.0 }
 0x7d8   : > { %v2232_v17 = vsel %vm1109_vm9, %v2214_v21, %v2231_v42  ;;  %v2671_v46 = vsel %vm1105_vm7, %v2641_v26, %v2670_v19  ;;  %v1278_v7 = vsel %vm1030_vm2, %v1264_v30, 0.0  ;;  %v1272_v47 = vrot.slane %v1271_v58, 4 }
 0x7d9   : > { %v2672_v52 = vsel %vm1107_vm8, %v2648_v14, %v2671_v46  ;;  %v1234_v40 = vpop.permute.xlu0 %1233  ;;  %v1285_v55 = vsel %vm1030_vm2, %v1265_v57, 0.0  ;;  %v1279_v23 = vrot.slane %v1278_v7, 4 }
 0x7da   : > { %v2673_v36 = vsel %vm1109_vm9, %v2655_v43, %v2672_v52  ;;  %v1241_v62 = vpop.permute.xlu1 %1240  ;;  %v1266_v59 = vmul.f32 %v5050_v39, %v1234_v40  ;;  %v1286_v9 = vrot.slane %v1285_v55, 4  ;;  %v1273_v44 = vadd.f32 %v1272_v47, %v1271_v58 }
 0x7db   : > { %v1267_v15 = vmul.f32 %v5064_v10, %v1241_v62  ;;  %v1280_v33 = vadd.f32 %v1279_v23, %v1278_v7 }
 0x7dc   : > { %v1292_v63 = vsel %vm1030_vm2, %v1266_v59, 0.0  ;;  %v1287_v53 = vadd.f32 %v1286_v9, %v1285_v55  ;;  %v1274_v16 = vrot.slane %v1273_v44, 2 }
 0x7dd   : > { %v1248_v41 = vpop.permute.xlu0 %1247  ;;  %v1299_v11 = vsel %vm1030_vm2, %v1267_v15, 0.0  ;;  %v1293_v39 = vrot.slane %v1292_v63, 4  ;;  %v1281_v20 = vrot.slane %v1280_v33, 2 }
 0x7de   : > { %v1255_v22 = vpop.permute.xlu1 %1254  ;;  %v1268_v4 = vmul.f32 %v5080_v54, %v1248_v41  ;;  %v1300_v28 = vrot.slane %v1299_v11, 4  ;;  %v1288_v3 = vrot.slane %v1287_v53, 2 }
 0x7df   : > { %v1269_v61 = vmul.f32 %v5084_v5, %v1255_v22  ;;  %v1294_v8 = vadd.f32 %v1293_v39, %v1292_v63 }
 0x7e0   : > { %v1306_v10 = vsel %vm1030_vm2, %v1268_v4, 0.0  ;;  %v1301_v26 = vadd.f32 %v1300_v28, %v1299_v11  ;;  %v3558_v28 = vld [vmem:[%s4548_s3] sm:$0xff] }
 0x7e1   : > { %v1262_v6 = vpop.permute.xlu0 %1261  ;;  %v1313_v12 = vsel %vm1030_vm2, %v1269_v61, 0.0  ;;  %v1307_v54 = vrot.slane %v1306_v10, 4  ;;  %v1295_v21 = vrot.slane %v1294_v8, 2 }
 0x7e2   : > { %v1270_v27 = vmul.f32 %v5094_v1, %v1262_v6  ;;  %v1314_v48 = vrot.slane %v1313_v12, 4 }
 0x7e3   : > { %v1308_v34 = vadd.f32 %v1307_v54, %v1306_v10  ;;  %v1296_v13 = vadd.f32 %v1295_v21, %v1294_v8 }
 0x7e4   : > { %v1320_v5 = vsel %vm1030_vm2, %v1270_v27, 0.0  ;;  %v1315_v25 = vadd.f32 %v1314_v48, %v1313_v12 }
 0x7e5   : > { %v1321_v14 = vrot.slane %v1320_v5, 4  ;;  %v1309_v42 = vrot.slane %v1308_v34, 2 }
 0x7e6   : > { %v1316_v43 = vrot.slane %v1315_v25, 2 }
 0x7e7   : > { %v1322_v19 = vadd.f32 %v1321_v14, %v1320_v5  ;;  %v1310_v52 = vadd.f32 %v1309_v42, %v1308_v34 }
 0x7e9   : > { %v1311_v35 = vrot.slane %v1310_v52, 1 }
 0x7eb   : > { %v1312_v58 = vadd.f32 %v1311_v35, %v1310_v52 }
 0x80c   : > { %v1862_v56 = vpop.f32.mrb[8].mxu1 }
 0x80d   : > { %v1863_v38 = vadd.f32 %v1862_v56, %v1791_v31  ;;  %v3296_v45 = vpop.f32.mrb[9].mxu1  ;;  %v1275_v31 = vadd.f32 %v1274_v16, %v1273_v44  ;;  %v1282_v56 = vadd.f32 %v1281_v20, %v1280_v33  ;;  %v3196_v44 = vld [vmem:[#allocation19] ss:$0 sm:$0xff] }
 0x80e   : > { %v1302_v45 = vrot.slane %v1301_v26, 2 }
 0x80f   : > { %2749 = vrot.lane.b32.xlu1 %v1863_v38, %s4077_s27  ;;  %v1289_v38 = vadd.f32 %v1288_v3, %v1287_v53  ;;  %v1276_v1 = vrot.slane %v1275_v31, 1  ;;  %v1283_v60 = vrot.slane %v1282_v56, 1 }
 0x810   : > { %v2303_v49 = vpop.f32.mrb[10].mxu1 }
 0x811   : > { %v2304_v50 = vadd.f32 %v2303_v49, %v2232_v17  ;;  %v3306_v24 = vpop.f32.mrb[11].mxu1  ;;  %v1290_v17 = vrot.slane %v1289_v38, 1  ;;  %v1303_v49 = vadd.f32 %v1302_v45, %v1301_v26  ;;  %v1277_v46 = vadd.f32 %v1276_v1, %v1275_v31 }
 0x812   : > { %v1297_v24 = vrot.slane %v1296_v13, 1 }
 0x813   : > { %2753 = vrot.lane.b32.xlu0 %v2304_v50, %s4078_s5  ;;  %v1284_v50 = vadd.f32 %v1283_v60, %v1282_v56  ;;  %s4080_s5 = smov [#allocation24]  }
 0x814   : > { %v2744_v0 = vpop.f32.mrb[12].mxu1  ;;  %v1298_v37 = vadd.f32 %v1297_v24, %v1296_v13 }
 0x815   : > { %v2745_v32 = vadd.f32 %v2744_v0, %v2673_v36  ;;  %v3316_v51 = vpop.f32.mrb[13].mxu1  ;;  %v1323_v36 = vrot.slane %v1322_v19, 2  ;;  %v1291_v0 = vadd.f32 %v1290_v17, %v1289_v38  ;;  %v1335_v2 = vsel %vm1097_vm3, %v1284_v50, %v1277_v46 }
 0x816   : > { %v1317_v51 = vadd.f32 %v1316_v43, %v1315_v25 }
 0x817   : > { %2757 = vrot.lane.b32.xlu1 %v2745_v32, %s4079_s28  ;;  %v1304_v32 = vrot.slane %v1303_v49, 1  ;;  %v1324_v40 = vadd.f32 %v1323_v36, %v1322_v19  ;;  %v1336_v29 = vsel %vm1099_vm4, %v1291_v0, %v1335_v2  ;;  %s3931_s28 = sshll.u32 %s4080_s5, 4  ;;  %s3932_s28 = int_to_ptr.vmem [resolvable:$false] %s3931_s28 }
 0x818   : > { %v1318_v62 = vrot.slane %v1317_v51, 1  ;;  %v1337_v57 = vsel %vm1101_vm5, %v1298_v37, %v1336_v29  ;;  %s3933_s13 = scalar_lea.vmem %s3932_s28, 1024  ;;  %p3934_p4 = scmp.lt.s32.totalorder %s5188_s1, %s3932_s28 }
 0x819   : > { %v1305_v30 = vadd.f32 %v1304_v32, %v1303_v49  ;;  %v1325_v41 = vrot.slane %v1324_v40, 1  ;;  %p3935_p12 = scmp.lt.s32.totalorder %s3933_s13, %s3927_s14 }
 0x81a   : > { %v1319_v59 = vadd.f32 %v1318_v62, %v1317_v51 }
 0x81b   : > { %v1338_v7 = vsel %vm1103_vm6, %v1305_v30, %v1337_v57  ;;  %v1326_v55 = vadd.f32 %v1325_v41, %v1324_v40  ;;  %p3936_p13 = por %p3935_p12, %p3934_p4 }
 0x81c   : > { %v1339_v15 = vsel %vm1105_vm7, %v1312_v58, %v1338_v7 }
 0x81d   : > { %v1340_v47 = vsel %vm1107_vm8, %v1319_v59, %v1339_v15  ;;  %p3937_p1 = pnand %p3936_p13, %p3930_p8 }
 0x81e   : > { %v1341_v22 = vsel %vm1109_vm9, %v1326_v55, %v1340_v47 }
 0x81f   : > { %v1413_v9 = vadd.f32 %v4901_v18, %v1341_v22 }
 0x881   : > { %v2750_v23 = vpop.permute.xlu1 %2749 }
 0x882   : > { %v2760_v4 = vsel %vm1030_vm2, %v1413_v9, %v2750_v23 }
 0x885   : > { %v2754_v63 = vpop.permute.xlu0 %2753 }
 0x886   : > { %v2762_v11 = vsel %vm2761_vm10, %v2760_v4, %v2754_v63 }
 0x889   : > { %v2758_v61 = vpop.permute.xlu1 %2757 }
 0x88a   : > { %v2764_v6 = vsel %vm2763_vm11, %v2762_v11, %v2758_v61 }
 0x88b   : > { %3326 = vmatmul.mubr.msk.f32.vlgmr.msra.gmra.mrb[8].mxu0 %vm696_vm1, %v2764_v6 }
 0x95e   : > { %v2845_v33 = vpop.f32.mrb[8].mxu0 }
 0x95f   : > { %v2846_v39 = vadd.f32 %v3196_v44, %v2845_v33  ;;  %v3327_v53 = vpop.f32.mrb[9].mxu0 }
 0x961   : > { %v2849_v10 = vadd.f32 %v3558_v28, %v2846_v39 }
 0x963   : > { %v2850_v18 = vsel %vm696_vm1, %v2849_v10, 0.0 }
 0x964   : > { %2851 = vadd.xlane.f32.xlu0 %v2850_v18 }
 0x9f1   : > { %v2852_v27 = vpop.xlane.xlu0 %2851 }
 0x9f2   : > { %v2854_v12 = vmul.f32 0.03125, %v2852_v27 }
 0x9f4   : > { %v2855_v16 = vsub.f32 %v2849_v10, %v2854_v12 }
 0x9f6   : > { %v2856_v20 = vmul.f32 %v2855_v16, %v2855_v16 }
 0x9f8   : > { %v2857_v8 = vsel %vm696_vm1, %v2856_v20, 0.0 }
 0x9f9   : > { %2858 = vadd.xlane.f32.xlu1 %v2857_v8 }
 0x9fa   : > { %3940 = shalt.err (!%p3937_p1)
}
 0x9fb   : > { %s3941_s26 = scalar_lea.hbm %s5194_s0, 512  ;;  %s3945_s5 = scalar_lea.hbm %s5346_s24, 1024 }
 0x9fc   : > { %p3942_p3 = scmp.ne.s32.totalorder %s5194_s0, %s3941_s26  ;;  %p3946_p10 = scmp.lt.u32.totalorder %s5194_s0, %s5346_s24 }
 0x9fd   : > { %p3947_p5 = scmp.lt.u32.totalorder %s3945_s5, %s3941_s26  ;;  %p3949_p0 = scmp.lt.u32.totalorder %s3941_s26, %s5194_s0 }
 0x9fe   : > { %p3943_p2 = pnand %p3942_p3, %p5347_p7 }
 0x9ff   : > { %p3948_p9 = por %p3947_p5, %p3946_p10 }
 0xa00   : > { %p3944_p6 = pneg %p3943_p2 }
 0xa01   : > { %p3950_p11 = por %p3949_p0, %p3948_p9 }
 0xa03   : > { %p3951_p8 = pnand %p3950_p11, %p3944_p6 }
 0xa05   : > { %3954 = shalt.err (!%p3951_p8)
}
 0xa06   : > { %s4081_s14 = smov 128   ;;  %v3198_v48 = vld [vmem:[#allocation20] ss:$0 sm:$0xff]  ;;  %v3199_v56 = vld [vmem:[#allocation22] ss:$0 sm:$0xff]  ;;  %s3202_s21 = sshll.u32 %s5331_s4, 7 }
 0xa07   : > { %3401 = dma.vmem_to_hbm [thread:$0]  (%p5347_p7), %s5188_s1, 512, %s5194_s0, %s2887_s22, %s4081_s14, %s4081_s14, %s4077_s27  }
 0xa08   : > { %s5348_s13 = sshll.u32 %s4542_s2, 3  ;;  %s5349_s28 = sld [smem:[#allocation44_spill]] }
 0xa09   : > { %s667_s26 = scalar_lea.vmem [#allocation23], %s5348_s13  ;;  %s2882_s1 = scalar_lea.sflag [#allocation4], %s4542_s2 }
 0xa0a   : > { %s2900_s3 = sshll.u32 %s667_s26, 4  ;;  %s4082_s4 = smov [#allocation23]   ;;  %s5229_s3 = int_to_ptr.vmem [resolvable:$true] %s2900_s3 }
 0xa0b   : > { %s3955_s0 = scalar_lea.vmem %s5229_s3, 128  ;;  %s3959_s22 = sshll.u32 %s4082_s4, 4  ;;  %s3960_s22 = int_to_ptr.vmem [resolvable:$false] %s3959_s22 }
 0xa0c   : > { %p3956_p4 = scmp.ne.s32.totalorder %s5229_s3, %s3955_s0  ;;  %s3961_s14 = scalar_lea.vmem %s3960_s22, 256 }
 0xa0d   : > { %p3962_p1 = scmp.lt.s32.totalorder %s5229_s3, %s3960_s22  ;;  %p3963_p3 = scmp.lt.s32.totalorder %s3961_s14, %s3955_s0 }
 0xa0e   : > { %s5227_s27 = scalar_lea.hbm %s5349_s28, %s3202_s21  ;;  %p3957_p12 = pnand %p3956_p4, %p5347_p7 }
 0xa0f   : > { %p3964_p2 = por %p3963_p3, %p3962_p1 }
 0xa10   : > { %p3958_p13 = pneg %p3957_p12 }
 0xa12   : > { %p3965_p6 = pnand %p3964_p2, %p3958_p13 }
 0xa86   : > { %v2859_v54 = vpop.xlane.xlu1 %2858 }
 0xa87   : > { %v2860_v3 = vmul.f32 0.03125, %v2859_v54 }
 0xa89   : > { %v2861_v26 = vadd.f32 1e-12, %v2860_v3 }
 0xa8b   : > { %3548 = vrsqrt.f32 %v2861_v26 }
 0xa95   : > { %v3549_v5 = vpop.eup %3548 }
 0xa96   : > { %v2870_v31 = vmul.f32 %v3549_v5, %v3198_v48 }
 0xa98   : > { %v2871_v21 = vmul.f32 %v2870_v31, %v2855_v16 }
 0xa9a   : > { %v2879_v34 = vadd.f32 %v3199_v56, %v2871_v21 }
 0xa9c   : > { %2880 = vst.msk [vmem:[%s667_s26] sm:$0xff] %vm696_vm1, %v2879_v34 }
 0xa9d   : > { %3968 = shalt.err (!%p3965_p6)
}
 0xa9e   : > { %s3969_s2 = scalar_lea.hbm %s5227_s27, 128  ;;  %s3973_s26 = scalar_lea.hbm %s5349_s28, 256 }
 0xa9f   : > { %p3970_p10 = scmp.ne.s32.totalorder %s5227_s27, %s3969_s2  ;;  %p3974_p0 = scmp.lt.u32.totalorder %s5227_s27, %s5349_s28 }
 0xaa0   : > { %p3975_p11 = scmp.lt.u32.totalorder %s3973_s26, %s3969_s2  ;;  %p3977_p4 = scmp.lt.u32.totalorder %s3969_s2, %s5227_s27 }
 0xaa1   : > { %p3971_p5 = pnand %p3970_p10, %p5347_p7 }
 0xaa2   : > { %p3976_p8 = por %p3975_p11, %p3974_p0 }
 0xaa3   : > { %p3972_p9 = pneg %p3971_p5 }
 0xaa4   : > { %p3978_p12 = por %p3977_p4, %p3976_p8 }
 0xaa6   : > { %p3979_p13 = pnand %p3978_p12, %p3972_p9 }
 0xaa8   : > { %3982 = shalt.err (!%p3979_p13)
}
 0xaa9   : > { %3400 = dma.vmem_to_hbm [thread:$0]  (%p5347_p7), %s5229_s3, 128, %s5227_s27, %s2882_s1  }
 0xaaa PF: > { %s2928_s0 = sand.u32 1, %s4041_s29   ;;  %p5350_p1 = scmp.ne.s32.totalorder %s5323_s18, 0 }
 0xaab   : > { %p5351_p3 = scmp.ge.s32.totalorder %s4053_s16, 2  ;;  %s2929_s4 = scalar_lea.sflag [#allocation4], %s2928_s0 }
 0xaad   : > { %p3446_p2 = pnand %p5351_p3, %p5350_p1 }
 0xaaf   : > { %4032 = dma.done.wait (!%p3446_p2), %s2929_s4, 128  }
 0xab0   : > { %4034 = vsyncadd (!%p3446_p2), %s2929_s4, 4294967168  ;;  %s2938_s22 = scalar_lea.sflag [#allocation25], %s2928_s0 }
 0xab1   : > { %4036 = dma.done.wait (!%p3446_p2), %s2938_s22, 512  }
 0xab2   : > { %4038 = vsyncadd (!%p3446_p2), %s2938_s22, 4294966784  ;;  %p39_p7 = scmp.ge.s32.totalorder %s4439_s23, 4   ;;  %s5352_s29 = smov %s4045_s30 }
 0xab3   : > { %s5353_s30 = smov %s4049_s15  ;;  %s5354_s15 = smov %s4451_s17 }
 0xab4   : > { %s5355_s16 = smov %s4439_s23  ;;  %41 = sbr.rel (!%p39_p7) target bundleno = 23 (0x17), region = 194 }
 0xabb   :  { %2943 = vsyncpa [#allocation3], 1 }
 0xabc   :  { %2945 = vsyncpa [#allocation3 + $0x1], 1 }
 0xabd   :  { %2946 = vsyncpa [#allocation6], 1 }
 0xabe   :  { %2948 = vsyncpa [#allocation6 + $0x1], 1 }
 0xabf   :  { %2949 = vsyncpa [#allocation9], 1 }
 0xac0   :  { %2950 = vsyncpa [#allocation12], 1 }
 0xac1   :  { %2951 = vsyncpa [#allocation15], 1 }
 0xac2   :  { %2952 = vsyncpa [#allocation18], 1 }
 0xac3   :  { %2953 = vsyncpa [#allocation21], 1 }
 0xac4   :  { %2954 = vsyncpa [#allocation4], 1 }
 0xac5   :  { %2956 = vsyncpa [#allocation4 + $0x1], 1 }
 0xac6   :  { %2957 = vsyncpa [#allocation25], 1 }
 0xac7   :  { %2959 = vsyncpa [#allocation25 + $0x1], 1 }

</bundles_post_ra>
